<compile_context>
chip_gen: v5e
topology: v5e:2x2
jax: 0.10.0
libtpu: 0.0.40
codegen_flags: <defaults>
</compile_context>

<pallas_src>
import functools

import jax
import jax.numpy as jnp
from jax import lax
from jax.experimental import pallas as pl
from jax.experimental.pallas import tpu as pltpu


N_BITS = 8
LANE = 128


# ---------------------------------------------------------------------------
# Shared fake-quant math (wrapper-side weight quant and the pure-JAX reference).
# ---------------------------------------------------------------------------
def _fake_quant(v, n_bits):
    """Uniform affine fake quantization, per-tensor min/max clamped to include 0."""
    n_levels = 2 ** n_bits
    v_min = jnp.minimum(jnp.min(v), 0.0)
    v_max = jnp.maximum(jnp.max(v), 0.0)
    delta = (v_max - v_min) / (n_levels - 1)
    delta = jnp.where(delta <= 1e-8, 1.0, delta)
    inv_delta = 1.0 / delta
    zp = jnp.round(-v_min * inv_delta)
    q = jnp.clip(jnp.round(v * inv_delta) + zp, 0.0, n_levels - 1)
    return (q - zp) * delta


# ---------------------------------------------------------------------------
# Fused Pallas kernel: conv1 + ReLU + act-quant -> conv2 + ReLU + act-quant
#                      -> fc   (all intermediates stay in vregs; no scratch)
# Activation rows are (h, b)-major: row r = h*B + b, lanes = w*C + c.
# ---------------------------------------------------------------------------
def fused_quant_model_kernel(x_ref, w1_ref, b1_ref, w2_ref, b2_ref,
                             wf_ref, bf_ref, o_ref, *, n_bits, bsz):
    f32 = jnp.float32
    bf16 = jnp.bfloat16
    nh = x_ref.shape[0]                       # B*H
    hsz = nh // bsz
    n_levels = 2 ** n_bits

    # Image-boundary validity masks for the h-direction taps (shared by both
    # convs): with (h, b)-major rows, "h-1 exists" <=> row >= B, etc.
    rows = lax.broadcasted_iota(jnp.int32, (nh, 1), 0)
    has_up = rows >= bsz                       # h-1 inside the image
    has_dn = rows < (nh - bsz)                 # h+1 inside the image

    def conv3x3_relu_quant(a, wq_ref, b_row_ref):
        # a: (NH, W*Cin) f32; wq_ref: (3*W*Cin, W*Cout) pre-quantized bf16.
        # The h-direction taps are sublane rolls (+mask); the w-direction taps
        # and zero padding live in the block-banded weight, so the whole conv
        # is ONE lane-dense MXU matmul.
        up = jnp.where(has_up, pltpu.roll(a, shift=bsz, axis=0), 0.0)       # h-1
        dn = jnp.where(has_dn, pltpu.roll(a, shift=nh - bsz, axis=0), 0.0)  # h+1
        cat = jnp.concatenate([up, a, dn], axis=1).astype(bf16)
        acc = jnp.dot(cat, wq_ref[...], preferred_element_type=f32)
        act = jnp.maximum(acc + b_row_ref[...], 0.0)       # bias + absorbed ReLU
        # Activation fake-quant.  Post-ReLU act >= 0, so the 0-clamped minimum
        # is exactly 0 and zero_point == 0: a single max reduction + scalar
        # reciprocal + mul/round/clip (identical numerics to _fake_quant).
        v_max = jnp.max(act)
        delta = v_max / (n_levels - 1)
        delta = jnp.where(delta <= 1e-8, 1.0, delta)
        q = jnp.clip(jnp.round(act * (1.0 / delta)), 0.0, n_levels - 1)
        return q * delta

    a1 = conv3x3_relu_quant(x_ref[...], w1_ref, b1_ref)
    a2 = conv3x3_relu_quant(a1, w2_ref, b2_ref)

    # Final Linear without materializing a flattened activation: with
    # (h, b)-major rows, logits[b] = sum_h a2[h*B:(h+1)*B, :] @ wf[h*WC2:(h+1)*WC2, :]
    # (the FC weight was permuted/padded in the wrapper to this order).
    # No ReLU and no output activation quant (disable_network_output_quantization).
    wc2 = a2.shape[1]
    acc = jnp.zeros((bsz, o_ref.shape[1]), f32)
    for h in range(hsz):
        lhs = a2[h * bsz:(h + 1) * bsz, :].astype(bf16)
        acc = acc + jnp.dot(lhs, wf_ref[h * wc2:(h + 1) * wc2, :],
                            preferred_element_type=f32)
    o_ref[...] = acc + bf_ref[...]


# ---------------------------------------------------------------------------
# Wrapper-side weight preprocessing (tiny, weights-only layout plumbing).
# ---------------------------------------------------------------------------
def _expand_conv_weight(w_oihw, width):
    """Conv2d weight (Cout, Cin, 3, 3) -> (3*W*Cin, W*Cout) stacked per-dy
    block-banded matmul weights:
        M[dy][wi*Cin + ci, wo*Cout + co] = w[co, ci, dy+1, wi-wo+1] if |wi-wo|<=1
                                           else 0
    so a 3x3 same-padding conv on (B*H, W*Cin) rows becomes one lane-dense
    matmul; the W-direction taps and zero padding live in the band structure.
    """
    cout, cin, kh, kw = w_oihw.shape
    wi = jnp.arange(width)[:, None]
    wo = jnp.arange(width)[None, :]
    dx = wi - wo                                     # (W, W)
    valid = jnp.abs(dx) <= 1
    kw_idx = jnp.clip(dx + 1, 0, kw - 1)             # (W, W)
    wt = jnp.transpose(w_oihw, (2, 3, 1, 0))         # (KH, KW, Cin, Cout)
    g = wt[:, kw_idx, :, :]                          # (KH, W, W, Cin, Cout)
    g = jnp.where(valid[None, :, :, None, None], g, 0.0)
    m = jnp.transpose(g, (0, 1, 3, 2, 4))            # (KH, Wi, Cin, Wo, Cout)
    return m.reshape(kh * width * cin, width * cout)


# ---------------------------------------------------------------------------
# QuantModel forward: one fused pallas_call for the whole network.
# ---------------------------------------------------------------------------
def quant_model_forward(x_nchw, params, *, n_bits=N_BITS):
    f32 = jnp.float32
    bf16 = jnp.bfloat16

    bsz, cin, hsz, wsz = x_nchw.shape
    c1 = params["conv1_w"].shape[0]
    c2 = params["conv2_w"].shape[0]
    ncls = params["fc_w"].shape[0]
    nh = bsz * hsz

    assert nh % 8 == 0, "B*H must be a multiple of 8 (f32 sublane tile)"
    assert (wsz * c1) % LANE == 0 and (wsz * c2) % LANE == 0, \
        "W*Cout must be a multiple of 128 for lane-dense conv outputs"
    assert ncls <= LANE

    # Input layout plumbing: NCHW -> (H*B, W*Cin) rows = (h, b), lanes = (w, c).
    x_rows = jnp.transpose(x_nchw.astype(f32), (2, 0, 3, 1)).reshape(nh, wsz * cin)

    # Weight fake-quant hoisted here, applied to the COMPACT weights (identical
    # to quantizing the expanded/padded weights), then expanded + cast to bf16
    # so the kernel's MXU operands arrive ready to use.
    w1q = _fake_quant(params["conv1_w"].astype(f32), n_bits)
    w2q = _fake_quant(params["conv2_w"].astype(f32), n_bits)
    fwq = _fake_quant(params["fc_w"].astype(f32), n_bits)

    w1 = _expand_conv_weight(w1q, wsz).astype(bf16)          # (3*W*Cin, W*C1)
    w2 = _expand_conv_weight(w2q, wsz).astype(bf16)          # (3*W*C1,  W*C2)
    b1 = jnp.tile(params["conv1_b"].astype(f32), wsz).reshape(1, wsz * c1)
    b2 = jnp.tile(params["conv2_b"].astype(f32), wsz).reshape(1, wsz * c2)

    # FC weight permuted from PyTorch's channel-major flatten (c, h, w) to the
    # kernel's per-h (w, c) blocks and padded to a lane-dense 128-wide output.
    fw = fwq.reshape(ncls, c2, hsz, wsz)
    fw = jnp.transpose(fw, (2, 3, 1, 0)).reshape(hsz * wsz * c2, ncls)
    fw = jnp.pad(fw, ((0, 0), (0, LANE - ncls))).astype(bf16)
    fb = jnp.pad(params["fc_b"].astype(f32), (0, LANE - ncls)).reshape(1, LANE)

    kernel = functools.partial(fused_quant_model_kernel, n_bits=n_bits, bsz=bsz)
    out_pad = pl.pallas_call(
        kernel,
        out_shape=jax.ShapeDtypeStruct((bsz, LANE), jnp.float32),
        in_specs=[pl.BlockSpec(memory_space=pltpu.MemorySpace.VMEM)
                  for _ in range(7)],
        out_specs=pl.BlockSpec(memory_space=pltpu.MemorySpace.VMEM),
    )(x_rows, w1, b1, w2, b2, fw, fb)
    return out_pad[:, :ncls]


# ---------------------------------------------------------------------------
# Pure-JAX reference (mirrors the kernel's numerics: f32 fake-quant,
# bf16 MXU operands, f32 accumulation) — used only for a sanity check.
# ---------------------------------------------------------------------------
def _reference_forward(x_nchw, params, *, n_bits=N_BITS):
    f32 = jnp.float32
    bf16 = jnp.bfloat16

    def conv(x, w, b):
        wq = _fake_quant(w.astype(f32), n_bits).astype(bf16)
        y = lax.conv_general_dilated(
            x.astype(bf16), wq, window_strides=(1, 1), padding="SAME",
            dimension_numbers=("NCHW", "OIHW", "NCHW"),
            preferred_element_type=f32)
        y = y + b.astype(f32)[None, :, None, None]
        y = jnp.maximum(y, 0.0)
        return _fake_quant(y, n_bits)

    a1 = conv(x_nchw.astype(f32), params["conv1_w"], params["conv1_b"])
    a2 = conv(a1, params["conv2_w"], params["conv2_b"])
    flat = a2.reshape(a2.shape[0], -1)                 # channel-major flatten
    wq = _fake_quant(params["fc_w"].astype(f32), n_bits).astype(bf16)
    out = jnp.dot(flat.astype(bf16), wq.T, preferred_element_type=f32)
    return out + params["fc_b"].astype(f32)


# ---------------------------------------------------------------------------
# Deterministic parameter init (synthetic; QuantModel.__init__ shapes).
# ---------------------------------------------------------------------------
def init_params(key, cin=4, c1=8, c2=8, hw=16, num_classes=10):
    k = jax.random.split(key, 6)
    scale1 = 1.0 / jnp.sqrt(cin * 9)
    scale2 = 1.0 / jnp.sqrt(c1 * 9)
    scale3 = 1.0 / jnp.sqrt(c2 * hw * hw)
    return {
        "conv1_w": jax.random.normal(k[0], (c1, cin, 3, 3), jnp.float32) * scale1,
        "conv1_b": jax.random.normal(k[1], (c1,), jnp.float32) * 0.1,
        "conv2_w": jax.random.normal(k[2], (c2, c1, 3, 3), jnp.float32) * scale2,
        "conv2_b": jax.random.normal(k[3], (c2,), jnp.float32) * 0.1,
        "fc_w": jax.random.normal(k[4], (num_classes, c2 * hw * hw),
                                  jnp.float32) * scale3,
        "fc_b": jax.random.normal(k[5], (num_classes,), jnp.float32) * 0.1,
    }


if __name__ == "__main__":
    key = jax.random.PRNGKey(0)
    pkey, xkey = jax.random.split(key)
    params = init_params(pkey)

    # PyTorch-style NCHW input: batch=2, channels=4, spatial=16x16.
    x = jax.random.normal(xkey, (2, 4, 16, 16), jnp.float32)

    fwd = jax.jit(quant_model_forward)
    out = fwd(x, params)
    jax.block_until_ready(out)

    assert out.shape == (2, 10)
    assert bool(jnp.all(jnp.isfinite(out)))

    # Sanity check against a pure-JAX reference with matching numerics; the only
    # legitimate divergence is bf16/f32 accumulation-order rounding (and the
    # rare quant-rounding flip it can trigger), so the tolerance is tight.
    ref = jax.jit(_reference_forward)(x, params)
    max_err = float(jnp.max(jnp.abs(out - ref)))
    assert max_err < 2e-2, f"kernel/reference mismatch: max_err={max_err}"

    print("KERNEL_OK")
</pallas_src>

<mosaic_0001>
module attributes {stable_mosaic.version = 11 : i64} {
  func.func @fused_quant_model_kernel(%arg0: memref<32x64xf32, #tpu.memory_space<vmem>>, %arg1: memref<192x128xbf16, #tpu.memory_space<vmem>>, %arg2: memref<1x128xf32, #tpu.memory_space<vmem>>, %arg3: memref<384x128xbf16, #tpu.memory_space<vmem>>, %arg4: memref<1x128xf32, #tpu.memory_space<vmem>>, %arg5: memref<2048x128xbf16, #tpu.memory_space<vmem>>, %arg6: memref<1x128xf32, #tpu.memory_space<vmem>>, %arg7: memref<2x128xf32, #tpu.memory_space<vmem>>) attributes {dimension_semantics = [], scalar_prefetch = 0 : i64, scratch_operands = 0 : i64, tpu.core_type = #tpu.core_type<tc>} {
    %0 = tpu.iota {dimensions = array<i32: 0>} : vector<32x1xi32>
    %c2_i32 = arith.constant 2 : i32
    %1 = vector.broadcast %c2_i32 : i32 to vector<32x1xi32>
    %2 = arith.cmpi sge, %0, %1 : vector<32x1xi32>
    %c30_i32 = arith.constant 30 : i32
    %3 = vector.broadcast %c30_i32 : i32 to vector<32x1xi32>
    %4 = arith.cmpi slt, %0, %3 : vector<32x1xi32>
    %c0 = arith.constant 0 : index
    %c0_0 = arith.constant 0 : index
    %5 = vector.load %arg0[%c0, %c0_0] : memref<32x64xf32, #tpu.memory_space<vmem>>, vector<32x64xf32>
    %c2_i32_1 = arith.constant 2 : i32
    %6 = tpu.dynamic_rotate %5 by %c2_i32_1 dim 0 : vector<32x64xf32>, i32 -> vector<32x64xf32>
    %cst = arith.constant 0.000000e+00 : f32
    %7 = vector.shape_cast %2 : vector<32x1xi1> to vector<32x1xi1>
    %8 = vector.broadcast %7 : vector<32x1xi1> to vector<32x64xi1>
    %9 = vector.broadcast %cst : f32 to vector<32x64xf32>
    %10 = arith.select %8, %6, %9 : vector<32x64xi1>, vector<32x64xf32>
    %c30_i32_2 = arith.constant 30 : i32
    %11 = tpu.dynamic_rotate %5 by %c30_i32_2 dim 0 : vector<32x64xf32>, i32 -> vector<32x64xf32>
    %cst_3 = arith.constant 0.000000e+00 : f32
    %12 = vector.shape_cast %4 : vector<32x1xi1> to vector<32x1xi1>
    %13 = vector.broadcast %12 : vector<32x1xi1> to vector<32x64xi1>
    %14 = vector.broadcast %cst_3 : f32 to vector<32x64xf32>
    %15 = arith.select %13, %11, %14 : vector<32x64xi1>, vector<32x64xf32>
    %16 = tpu.concatenate %10, %5, %15 in 1 : vector<32x64xf32>, vector<32x64xf32>, vector<32x64xf32> -> vector<32x192xf32>
    %17 = arith.truncf %16 : vector<32x192xf32> to vector<32x192xbf16>
    %c0_4 = arith.constant 0 : index
    %c0_5 = arith.constant 0 : index
    %18 = vector.load %arg1[%c0_4, %c0_5] : memref<192x128xbf16, #tpu.memory_space<vmem>>, vector<192x128xbf16>
    %cst_6 = arith.constant dense<0.000000e+00> : vector<32x128xf32>
    %19 = tpu.matmul %17, %18, %cst_6 {dimension_numbers = #tpu.dot_dimension_numbers<[1], [0], [0], [1], [0, 0, 1, 1], [], []>} : vector<32x192xbf16>, vector<192x128xbf16>, vector<32x128xf32> -> vector<32x128xf32>
    %c0_7 = arith.constant 0 : index
    %c0_8 = arith.constant 0 : index
    %20 = vector.load %arg2[%c0_7, %c0_8] : memref<1x128xf32, #tpu.memory_space<vmem>>, vector<1x128xf32>
    %21 = vector.broadcast %20 : vector<1x128xf32> to vector<32x128xf32>
    %22 = arith.addf %19, %21 : vector<32x128xf32>
    %cst_9 = arith.constant 0.000000e+00 : f32
    %23 = vector.broadcast %cst_9 : f32 to vector<32x128xf32>
    %24 = arith.maximumf %22, %23 : vector<32x128xf32>
    %25 = vector.shape_cast %24 : vector<32x128xf32> to vector<1x32x128xf32>
    %cst_10 = arith.constant dense<0xFF800000> : vector<1xf32>
    %26 = vector.multi_reduction <maximumf>, %25, %cst_10 [1, 2] : vector<1x32x128xf32> to vector<1xf32>
    %27 = vector.shape_cast %26 : vector<1xf32> to vector<1x1x1xf32>
    %28 = vector.extract %27[0, 0, 0] : f32 from vector<1x1x1xf32>
    %cst_11 = arith.constant 2.550000e+02 : f32
    %29 = arith.divf %28, %cst_11 : f32
    %cst_12 = arith.constant 9.99999993E-9 : f32
    %30 = arith.cmpf ole, %29, %cst_12 : f32
    %cst_13 = arith.constant 1.000000e+00 : f32
    %31 = arith.select %30, %cst_13, %29 : f32
    %cst_14 = arith.constant 1.000000e+00 : f32
    %32 = arith.divf %cst_14, %31 : f32
    %33 = vector.broadcast %32 : f32 to vector<32x128xf32>
    %34 = arith.mulf %24, %33 : vector<32x128xf32>
    %35 = math.roundeven %34 : vector<32x128xf32>
    %cst_15 = arith.constant 0.000000e+00 : f32
    %c255_i32 = arith.constant 255 : i32
    %36 = vector.broadcast %cst_15 : f32 to vector<32x128xf32>
    %37 = arith.maximumf %36, %35 : vector<32x128xf32>
    %38 = arith.sitofp %c255_i32 : i32 to f32
    %39 = vector.broadcast %38 : f32 to vector<32x128xf32>
    %40 = arith.minimumf %39, %37 : vector<32x128xf32>
    %41 = vector.broadcast %31 : f32 to vector<32x128xf32>
    %42 = arith.mulf %40, %41 : vector<32x128xf32>
    %c2_i32_16 = arith.constant 2 : i32
    %43 = tpu.dynamic_rotate %42 by %c2_i32_16 dim 0 : vector<32x128xf32>, i32 -> vector<32x128xf32>
    %cst_17 = arith.constant 0.000000e+00 : f32
    %44 = vector.shape_cast %2 : vector<32x1xi1> to vector<32x1xi1>
    %45 = vector.broadcast %44 : vector<32x1xi1> to vector<32x128xi1>
    %46 = vector.broadcast %cst_17 : f32 to vector<32x128xf32>
    %47 = arith.select %45, %43, %46 : vector<32x128xi1>, vector<32x128xf32>
    %c30_i32_18 = arith.constant 30 : i32
    %48 = tpu.dynamic_rotate %42 by %c30_i32_18 dim 0 : vector<32x128xf32>, i32 -> vector<32x128xf32>
    %cst_19 = arith.constant 0.000000e+00 : f32
    %49 = vector.shape_cast %4 : vector<32x1xi1> to vector<32x1xi1>
    %50 = vector.broadcast %49 : vector<32x1xi1> to vector<32x128xi1>
    %51 = vector.broadcast %cst_19 : f32 to vector<32x128xf32>
    %52 = arith.select %50, %48, %51 : vector<32x128xi1>, vector<32x128xf32>
    %53 = tpu.concatenate %47, %42, %52 in 1 : vector<32x128xf32>, vector<32x128xf32>, vector<32x128xf32> -> vector<32x384xf32>
    %54 = arith.truncf %53 : vector<32x384xf32> to vector<32x384xbf16>
    %c0_20 = arith.constant 0 : index
    %c0_21 = arith.constant 0 : index
    %55 = vector.load %arg3[%c0_20, %c0_21] : memref<384x128xbf16, #tpu.memory_space<vmem>>, vector<384x128xbf16>
    %cst_22 = arith.constant dense<0.000000e+00> : vector<32x128xf32>
    %56 = tpu.matmul %54, %55, %cst_22 {dimension_numbers = #tpu.dot_dimension_numbers<[1], [0], [0], [1], [0, 0, 1, 1], [], []>} : vector<32x384xbf16>, vector<384x128xbf16>, vector<32x128xf32> -> vector<32x128xf32>
    %c0_23 = arith.constant 0 : index
    %c0_24 = arith.constant 0 : index
    %57 = vector.load %arg4[%c0_23, %c0_24] : memref<1x128xf32, #tpu.memory_space<vmem>>, vector<1x128xf32>
    %58 = vector.broadcast %57 : vector<1x128xf32> to vector<32x128xf32>
    %59 = arith.addf %56, %58 : vector<32x128xf32>
    %cst_25 = arith.constant 0.000000e+00 : f32
    %60 = vector.broadcast %cst_25 : f32 to vector<32x128xf32>
    %61 = arith.maximumf %59, %60 : vector<32x128xf32>
    %62 = vector.shape_cast %61 : vector<32x128xf32> to vector<1x32x128xf32>
    %cst_26 = arith.constant dense<0xFF800000> : vector<1xf32>
    %63 = vector.multi_reduction <maximumf>, %62, %cst_26 [1, 2] : vector<1x32x128xf32> to vector<1xf32>
    %64 = vector.shape_cast %63 : vector<1xf32> to vector<1x1x1xf32>
    %65 = vector.extract %64[0, 0, 0] : f32 from vector<1x1x1xf32>
    %cst_27 = arith.constant 2.550000e+02 : f32
    %66 = arith.divf %65, %cst_27 : f32
    %cst_28 = arith.constant 9.99999993E-9 : f32
    %67 = arith.cmpf ole, %66, %cst_28 : f32
    %cst_29 = arith.constant 1.000000e+00 : f32
    %68 = arith.select %67, %cst_29, %66 : f32
    %cst_30 = arith.constant 1.000000e+00 : f32
    %69 = arith.divf %cst_30, %68 : f32
    %70 = vector.broadcast %69 : f32 to vector<32x128xf32>
    %71 = arith.mulf %61, %70 : vector<32x128xf32>
    %72 = math.roundeven %71 : vector<32x128xf32>
    %cst_31 = arith.constant 0.000000e+00 : f32
    %c255_i32_32 = arith.constant 255 : i32
    %73 = vector.broadcast %cst_31 : f32 to vector<32x128xf32>
    %74 = arith.maximumf %73, %72 : vector<32x128xf32>
    %75 = arith.sitofp %c255_i32_32 : i32 to f32
    %76 = vector.broadcast %75 : f32 to vector<32x128xf32>
    %77 = arith.minimumf %76, %74 : vector<32x128xf32>
    %78 = vector.broadcast %68 : f32 to vector<32x128xf32>
    %79 = arith.mulf %77, %78 : vector<32x128xf32>
    %cst_33 = arith.constant 0.000000e+00 : f32
    %80 = vector.broadcast %cst_33 : f32 to vector<2x128xf32>
    %81 = vector.extract_strided_slice %79 {offsets = [0, 0], sizes = [2, 128], strides = [1, 1]} : vector<32x128xf32> to vector<2x128xf32>
    %82 = arith.truncf %81 : vector<2x128xf32> to vector<2x128xbf16>
    %c0_34 = arith.constant 0 : index
    %c0_35 = arith.constant 0 : index
    %83 = vector.load %arg5[%c0_34, %c0_35] : memref<2048x128xbf16, #tpu.memory_space<vmem>>, vector<128x128xbf16>
    %cst_36 = arith.constant dense<0.000000e+00> : vector<2x128xf32>
    %84 = tpu.matmul %82, %83, %cst_36 {dimension_numbers = #tpu.dot_dimension_numbers<[1], [0], [0], [1], [0, 0, 1, 1], [], []>} : vector<2x128xbf16>, vector<128x128xbf16>, vector<2x128xf32> -> vector<2x128xf32>
    %85 = arith.addf %80, %84 : vector<2x128xf32>
    %86 = vector.extract_strided_slice %79 {offsets = [2, 0], sizes = [2, 128], strides = [1, 1]} : vector<32x128xf32> to vector<2x128xf32>
    %87 = arith.truncf %86 : vector<2x128xf32> to vector<2x128xbf16>
    %c128 = arith.constant 128 : index
    %c0_37 = arith.constant 0 : index
    %88 = vector.load %arg5[%c128, %c0_37] : memref<2048x128xbf16, #tpu.memory_space<vmem>>, vector<128x128xbf16>
    %cst_38 = arith.constant dense<0.000000e+00> : vector<2x128xf32>
    %89 = tpu.matmul %87, %88, %cst_38 {dimension_numbers = #tpu.dot_dimension_numbers<[1], [0], [0], [1], [0, 0, 1, 1], [], []>} : vector<2x128xbf16>, vector<128x128xbf16>, vector<2x128xf32> -> vector<2x128xf32>
    %90 = arith.addf %85, %89 : vector<2x128xf32>
    %91 = vector.extract_strided_slice %79 {offsets = [4, 0], sizes = [2, 128], strides = [1, 1]} : vector<32x128xf32> to vector<2x128xf32>
    %92 = arith.truncf %91 : vector<2x128xf32> to vector<2x128xbf16>
    %c256 = arith.constant 256 : index
    %c0_39 = arith.constant 0 : index
    %93 = vector.load %arg5[%c256, %c0_39] : memref<2048x128xbf16, #tpu.memory_space<vmem>>, vector<128x128xbf16>
    %cst_40 = arith.constant dense<0.000000e+00> : vector<2x128xf32>
    %94 = tpu.matmul %92, %93, %cst_40 {dimension_numbers = #tpu.dot_dimension_numbers<[1], [0], [0], [1], [0, 0, 1, 1], [], []>} : vector<2x128xbf16>, vector<128x128xbf16>, vector<2x128xf32> -> vector<2x128xf32>
    %95 = arith.addf %90, %94 : vector<2x128xf32>
    %96 = vector.extract_strided_slice %79 {offsets = [6, 0], sizes = [2, 128], strides = [1, 1]} : vector<32x128xf32> to vector<2x128xf32>
    %97 = arith.truncf %96 : vector<2x128xf32> to vector<2x128xbf16>
    %c384 = arith.constant 384 : index
    %c0_41 = arith.constant 0 : index
    %98 = vector.load %arg5[%c384, %c0_41] : memref<2048x128xbf16, #tpu.memory_space<vmem>>, vector<128x128xbf16>
    %cst_42 = arith.constant dense<0.000000e+00> : vector<2x128xf32>
    %99 = tpu.matmul %97, %98, %cst_42 {dimension_numbers = #tpu.dot_dimension_numbers<[1], [0], [0], [1], [0, 0, 1, 1], [], []>} : vector<2x128xbf16>, vector<128x128xbf16>, vector<2x128xf32> -> vector<2x128xf32>
    %100 = arith.addf %95, %99 : vector<2x128xf32>
    %101 = vector.extract_strided_slice %79 {offsets = [8, 0], sizes = [2, 128], strides = [1, 1]} : vector<32x128xf32> to vector<2x128xf32>
    %102 = arith.truncf %101 : vector<2x128xf32> to vector<2x128xbf16>
    %c512 = arith.constant 512 : index
    %c0_43 = arith.constant 0 : index
    %103 = vector.load %arg5[%c512, %c0_43] : memref<2048x128xbf16, #tpu.memory_space<vmem>>, vector<128x128xbf16>
    %cst_44 = arith.constant dense<0.000000e+00> : vector<2x128xf32>
    %104 = tpu.matmul %102, %103, %cst_44 {dimension_numbers = #tpu.dot_dimension_numbers<[1], [0], [0], [1], [0, 0, 1, 1], [], []>} : vector<2x128xbf16>, vector<128x128xbf16>, vector<2x128xf32> -> vector<2x128xf32>
    %105 = arith.addf %100, %104 : vector<2x128xf32>
    %106 = vector.extract_strided_slice %79 {offsets = [10, 0], sizes = [2, 128], strides = [1, 1]} : vector<32x128xf32> to vector<2x128xf32>
    %107 = arith.truncf %106 : vector<2x128xf32> to vector<2x128xbf16>
    %c640 = arith.constant 640 : index
    %c0_45 = arith.constant 0 : index
    %108 = vector.load %arg5[%c640, %c0_45] : memref<2048x128xbf16, #tpu.memory_space<vmem>>, vector<128x128xbf16>
    %cst_46 = arith.constant dense<0.000000e+00> : vector<2x128xf32>
    %109 = tpu.matmul %107, %108, %cst_46 {dimension_numbers = #tpu.dot_dimension_numbers<[1], [0], [0], [1], [0, 0, 1, 1], [], []>} : vector<2x128xbf16>, vector<128x128xbf16>, vector<2x128xf32> -> vector<2x128xf32>
    %110 = arith.addf %105, %109 : vector<2x128xf32>
    %111 = vector.extract_strided_slice %79 {offsets = [12, 0], sizes = [2, 128], strides = [1, 1]} : vector<32x128xf32> to vector<2x128xf32>
    %112 = arith.truncf %111 : vector<2x128xf32> to vector<2x128xbf16>
    %c768 = arith.constant 768 : index
    %c0_47 = arith.constant 0 : index
    %113 = vector.load %arg5[%c768, %c0_47] : memref<2048x128xbf16, #tpu.memory_space<vmem>>, vector<128x128xbf16>
    %cst_48 = arith.constant dense<0.000000e+00> : vector<2x128xf32>
    %114 = tpu.matmul %112, %113, %cst_48 {dimension_numbers = #tpu.dot_dimension_numbers<[1], [0], [0], [1], [0, 0, 1, 1], [], []>} : vector<2x128xbf16>, vector<128x128xbf16>, vector<2x128xf32> -> vector<2x128xf32>
    %115 = arith.addf %110, %114 : vector<2x128xf32>
    %116 = vector.extract_strided_slice %79 {offsets = [14, 0], sizes = [2, 128], strides = [1, 1]} : vector<32x128xf32> to vector<2x128xf32>
    %117 = arith.truncf %116 : vector<2x128xf32> to vector<2x128xbf16>
    %c896 = arith.constant 896 : index
    %c0_49 = arith.constant 0 : index
    %118 = vector.load %arg5[%c896, %c0_49] : memref<2048x128xbf16, #tpu.memory_space<vmem>>, vector<128x128xbf16>
    %cst_50 = arith.constant dense<0.000000e+00> : vector<2x128xf32>
    %119 = tpu.matmul %117, %118, %cst_50 {dimension_numbers = #tpu.dot_dimension_numbers<[1], [0], [0], [1], [0, 0, 1, 1], [], []>} : vector<2x128xbf16>, vector<128x128xbf16>, vector<2x128xf32> -> vector<2x128xf32>
    %120 = arith.addf %115, %119 : vector<2x128xf32>
    %121 = vector.extract_strided_slice %79 {offsets = [16, 0], sizes = [2, 128], strides = [1, 1]} : vector<32x128xf32> to vector<2x128xf32>
    %122 = arith.truncf %121 : vector<2x128xf32> to vector<2x128xbf16>
    %c1024 = arith.constant 1024 : index
    %c0_51 = arith.constant 0 : index
    %123 = vector.load %arg5[%c1024, %c0_51] : memref<2048x128xbf16, #tpu.memory_space<vmem>>, vector<128x128xbf16>
    %cst_52 = arith.constant dense<0.000000e+00> : vector<2x128xf32>
    %124 = tpu.matmul %122, %123, %cst_52 {dimension_numbers = #tpu.dot_dimension_numbers<[1], [0], [0], [1], [0, 0, 1, 1], [], []>} : vector<2x128xbf16>, vector<128x128xbf16>, vector<2x128xf32> -> vector<2x128xf32>
    %125 = arith.addf %120, %124 : vector<2x128xf32>
    %126 = vector.extract_strided_slice %79 {offsets = [18, 0], sizes = [2, 128], strides = [1, 1]} : vector<32x128xf32> to vector<2x128xf32>
    %127 = arith.truncf %126 : vector<2x128xf32> to vector<2x128xbf16>
    %c1152 = arith.constant 1152 : index
    %c0_53 = arith.constant 0 : index
    %128 = vector.load %arg5[%c1152, %c0_53] : memref<2048x128xbf16, #tpu.memory_space<vmem>>, vector<128x128xbf16>
    %cst_54 = arith.constant dense<0.000000e+00> : vector<2x128xf32>
    %129 = tpu.matmul %127, %128, %cst_54 {dimension_numbers = #tpu.dot_dimension_numbers<[1], [0], [0], [1], [0, 0, 1, 1], [], []>} : vector<2x128xbf16>, vector<128x128xbf16>, vector<2x128xf32> -> vector<2x128xf32>
    %130 = arith.addf %125, %129 : vector<2x128xf32>
    %131 = vector.extract_strided_slice %79 {offsets = [20, 0], sizes = [2, 128], strides = [1, 1]} : vector<32x128xf32> to vector<2x128xf32>
    %132 = arith.truncf %131 : vector<2x128xf32> to vector<2x128xbf16>
    %c1280 = arith.constant 1280 : index
    %c0_55 = arith.constant 0 : index
    %133 = vector.load %arg5[%c1280, %c0_55] : memref<2048x128xbf16, #tpu.memory_space<vmem>>, vector<128x128xbf16>
    %cst_56 = arith.constant dense<0.000000e+00> : vector<2x128xf32>
    %134 = tpu.matmul %132, %133, %cst_56 {dimension_numbers = #tpu.dot_dimension_numbers<[1], [0], [0], [1], [0, 0, 1, 1], [], []>} : vector<2x128xbf16>, vector<128x128xbf16>, vector<2x128xf32> -> vector<2x128xf32>
    %135 = arith.addf %130, %134 : vector<2x128xf32>
    %136 = vector.extract_strided_slice %79 {offsets = [22, 0], sizes = [2, 128], strides = [1, 1]} : vector<32x128xf32> to vector<2x128xf32>
    %137 = arith.truncf %136 : vector<2x128xf32> to vector<2x128xbf16>
    %c1408 = arith.constant 1408 : index
    %c0_57 = arith.constant 0 : index
    %138 = vector.load %arg5[%c1408, %c0_57] : memref<2048x128xbf16, #tpu.memory_space<vmem>>, vector<128x128xbf16>
    %cst_58 = arith.constant dense<0.000000e+00> : vector<2x128xf32>
    %139 = tpu.matmul %137, %138, %cst_58 {dimension_numbers = #tpu.dot_dimension_numbers<[1], [0], [0], [1], [0, 0, 1, 1], [], []>} : vector<2x128xbf16>, vector<128x128xbf16>, vector<2x128xf32> -> vector<2x128xf32>
    %140 = arith.addf %135, %139 : vector<2x128xf32>
    %141 = vector.extract_strided_slice %79 {offsets = [24, 0], sizes = [2, 128], strides = [1, 1]} : vector<32x128xf32> to vector<2x128xf32>
    %142 = arith.truncf %141 : vector<2x128xf32> to vector<2x128xbf16>
    %c1536 = arith.constant 1536 : index
    %c0_59 = arith.constant 0 : index
    %143 = vector.load %arg5[%c1536, %c0_59] : memref<2048x128xbf16, #tpu.memory_space<vmem>>, vector<128x128xbf16>
    %cst_60 = arith.constant dense<0.000000e+00> : vector<2x128xf32>
    %144 = tpu.matmul %142, %143, %cst_60 {dimension_numbers = #tpu.dot_dimension_numbers<[1], [0], [0], [1], [0, 0, 1, 1], [], []>} : vector<2x128xbf16>, vector<128x128xbf16>, vector<2x128xf32> -> vector<2x128xf32>
    %145 = arith.addf %140, %144 : vector<2x128xf32>
    %146 = vector.extract_strided_slice %79 {offsets = [26, 0], sizes = [2, 128], strides = [1, 1]} : vector<32x128xf32> to vector<2x128xf32>
    %147 = arith.truncf %146 : vector<2x128xf32> to vector<2x128xbf16>
    %c1664 = arith.constant 1664 : index
    %c0_61 = arith.constant 0 : index
    %148 = vector.load %arg5[%c1664, %c0_61] : memref<2048x128xbf16, #tpu.memory_space<vmem>>, vector<128x128xbf16>
    %cst_62 = arith.constant dense<0.000000e+00> : vector<2x128xf32>
    %149 = tpu.matmul %147, %148, %cst_62 {dimension_numbers = #tpu.dot_dimension_numbers<[1], [0], [0], [1], [0, 0, 1, 1], [], []>} : vector<2x128xbf16>, vector<128x128xbf16>, vector<2x128xf32> -> vector<2x128xf32>
    %150 = arith.addf %145, %149 : vector<2x128xf32>
    %151 = vector.extract_strided_slice %79 {offsets = [28, 0], sizes = [2, 128], strides = [1, 1]} : vector<32x128xf32> to vector<2x128xf32>
    %152 = arith.truncf %151 : vector<2x128xf32> to vector<2x128xbf16>
    %c1792 = arith.constant 1792 : index
    %c0_63 = arith.constant 0 : index
    %153 = vector.load %arg5[%c1792, %c0_63] : memref<2048x128xbf16, #tpu.memory_space<vmem>>, vector<128x128xbf16>
    %cst_64 = arith.constant dense<0.000000e+00> : vector<2x128xf32>
    %154 = tpu.matmul %152, %153, %cst_64 {dimension_numbers = #tpu.dot_dimension_numbers<[1], [0], [0], [1], [0, 0, 1, 1], [], []>} : vector<2x128xbf16>, vector<128x128xbf16>, vector<2x128xf32> -> vector<2x128xf32>
    %155 = arith.addf %150, %154 : vector<2x128xf32>
    %156 = vector.extract_strided_slice %79 {offsets = [30, 0], sizes = [2, 128], strides = [1, 1]} : vector<32x128xf32> to vector<2x128xf32>
    %157 = arith.truncf %156 : vector<2x128xf32> to vector<2x128xbf16>
    %c1920 = arith.constant 1920 : index
    %c0_65 = arith.constant 0 : index
    %158 = vector.load %arg5[%c1920, %c0_65] : memref<2048x128xbf16, #tpu.memory_space<vmem>>, vector<128x128xbf16>
    %cst_66 = arith.constant dense<0.000000e+00> : vector<2x128xf32>
    %159 = tpu.matmul %157, %158, %cst_66 {dimension_numbers = #tpu.dot_dimension_numbers<[1], [0], [0], [1], [0, 0, 1, 1], [], []>} : vector<2x128xbf16>, vector<128x128xbf16>, vector<2x128xf32> -> vector<2x128xf32>
    %160 = arith.addf %155, %159 : vector<2x128xf32>
    %c0_67 = arith.constant 0 : index
    %c0_68 = arith.constant 0 : index
    %161 = vector.load %arg6[%c0_67, %c0_68] : memref<1x128xf32, #tpu.memory_space<vmem>>, vector<1x128xf32>
    %162 = vector.broadcast %161 : vector<1x128xf32> to vector<2x128xf32>
    %163 = arith.addf %160, %162 : vector<2x128xf32>
    %c0_69 = arith.constant 0 : index
    %c0_70 = arith.constant 0 : index
    %164 = vector.load %arg7[%c0_69, %c0_70] : memref<2x128xf32, #tpu.memory_space<vmem>>, vector<2x128xf32>
    tpu.vector_store %arg7[%c0_69, %c0_70], %163 {strides = array<i32>} : memref<2x128xf32, #tpu.memory_space<vmem>>, vector<2x128xf32>,
    return
  }
}

</mosaic_0001>

<bundles_post_ra>
// kernel: tile.13
= control target key start
LH: loop header
LB: loop body
LE: loop exit
PB: predicated region body
PF: predicated region fallthrough
CT: control target
= control target key end

     0   :  { %s28_s0 = inlined_call_operand.vmem [shape: f32[8], index: 0, kind: input, shape index: {}]   ;;  %s29_s1 = inlined_call_operand.vmem [shape: f32[16,8], index: 1, kind: output, shape index: {}]  }
   0x1   :  { %v4_v0 = vld [vmem:[%s28_s0] ss:$0 sm:$0xff] }
   0x2   :  { %5 = vst [vmem:[%s29_s1] sm:$0xff] %v4_v0 }
   0x3   :  { %8 = vst [vmem:[%s29_s1 + $0x8] sm:$0xff] %v4_v0 }

// kernel: tile.14
= control target key start
LH: loop header
LB: loop body
LE: loop exit
PB: predicated region body
PF: predicated region fallthrough
CT: control target
= control target key end

     0   :  { %s131_s10 = smov 120   ;;  %s132_s11 = smov 104   ;;  %vm3_vm0 = vcmask 64512   ;;  %vm9_vm1 = vcmask 1048512   ;;  %vm15_vm2 = vcmask 982912   ;;  %vm21_vm3 = vcmask 917312   ;;  %s207_s0 = inlined_call_operand.vmem [shape: f32[16,8], index: 0, kind: input, shape index: {}]   ;;  %s208_s1 = inlined_call_operand.vmem [shape: f32[1,128], index: 1, kind: output, shape index: {}]  }
   0x1   :  { %v101_v0 = vld [vmem:[%s207_s0 + $0xf] sm:$0x1]   ;;  %v103_v1 = vld [vmem:[%s207_s0 + $0xd] sm:$0x1]   ;;  %v105_v2 = vld [vmem:[%s207_s0 + $0xb] sm:$0x1]  }
   0x2   :  { %7 = vrot.lane.b32.xlu0 %v101_v0, %s131_s10  ;;  %19 = vrot.lane.b32.xlu1 %v103_v1, %s132_s11  ;;  %s133_s14 = smov 88   ;;  %v102_v3 = vld [vmem:[%s207_s0 + $0xe] sm:$0x1]   ;;  %v104_v4 = vld [vmem:[%s207_s0 + $0xc] sm:$0x1]   ;;  %s134_s19 = smov 112  }
   0x3   :  { %31 = vrot.lane.b32.xlu2 %v105_v2, %s133_s14  ;;  %s135_s20 = smov 96   ;;  %v106_v5 = vld [vmem:[%s207_s0 + $0xa] sm:$0x1]   ;;  %s136_s23 = smov 80   ;;  %v107_v6 = vld [vmem:[%s207_s0 + $0x9] sm:$0x1]  }
   0x4   :  { %v108_v7 = vld [vmem:[%s207_s0 + $0x8] sm:$0x1]   ;;  %s137_s28 = smov 72   ;;  %s138_s29 = smov 64   ;;  %v109_v8 = vld [vmem:[%s207_s0 + $0x7] sm:$0x1]  }
   0x5   :  { %s139_s3 = smov 56   ;;  %v110_v9 = vld [vmem:[%s207_s0 + $0x6] sm:$0x1]   ;;  %v111_v10 = vld [vmem:[%s207_s0 + $0x5] sm:$0x1]   ;;  %s140_s8 = smov 48  }
   0x6   :  { %s141_s9 = smov 40   ;;  %v112_v11 = vld [vmem:[%s207_s0 + $0x4] sm:$0x1]   ;;  %s142_s12 = smov 32   ;;  %v113_v12 = vld [vmem:[%s207_s0 + $0x3] sm:$0x1]  }
   0x7   :  { %v114_v13 = vld [vmem:[%s207_s0 + $0x2] sm:$0x1]   ;;  %s143_s17 = smov 24   ;;  %s144_s18 = smov 16   ;;  %v115_v14 = vld [vmem:[%s207_s0 + $0x1] sm:$0x1]  }
   0x8   :  { %s145_s21 = smov 8   ;;  %v2_v15 = vld [vmem:[%s207_s0] sm:$0x1]   ;;  %vm27_vm4 = vcmask 851712   ;;  %vm33_vm5 = vcmask 786112   ;;  %vm39_vm6 = vcmask 720512  }
   0x9   :  { %4 = vst.msk [vmem:[#allocation0] sm:$0x1] %vm3_vm0, %v2_v15   ;;  %vm45_vm7 = vcmask 654912   ;;  %vm51_vm8 = vcmask 589312   ;;  %vm57_vm9 = vcmask 523712   ;;  %vm63_vm10 = vcmask 458112  }
   0xa   :  { %13 = vrot.lane.b32.xlu0 %v102_v3, %s134_s19  ;;  %25 = vrot.lane.b32.xlu1 %v104_v4, %s135_s20  ;;  %vm69_vm11 = vcmask 392512   ;;  %vm75_vm12 = vcmask 326912   ;;  %vm81_vm13 = vcmask 261312   ;;  %vm87_vm14 = vcmask 195712  }
   0xb   :  { %37 = vrot.lane.b32.xlu2 %v106_v5, %s136_s23  ;;  %vm93_vm15 = vcmask 130112  }
  0x12   :  { %43 = vrot.lane.b32.xlu0 %v107_v6, %s137_s28  ;;  %49 = vrot.lane.b32.xlu1 %v108_v7, %s138_s29 }
  0x13   :  { %55 = vrot.lane.b32.xlu2 %v109_v8, %s139_s3 }
  0x1a   :  { %61 = vrot.lane.b32.xlu0 %v110_v9, %s140_s8  ;;  %67 = vrot.lane.b32.xlu1 %v111_v10, %s141_s9 }
  0x1b   :  { %73 = vrot.lane.b32.xlu2 %v112_v11, %s142_s12 }
  0x22   :  { %79 = vrot.lane.b32.xlu0 %v113_v12, %s143_s17  ;;  %85 = vrot.lane.b32.xlu1 %v114_v13, %s144_s18 }
  0x23   :  { %91 = vrot.lane.b32.xlu2 %v115_v14, %s145_s21 }
  0x5d   :  { %v32_v16 = vpop.permute.xlu2 %31  }
  0x65   :  { %v38_v17 = vpop.permute.xlu2 %37  }
  0x6d   :  { %v56_v18 = vpop.permute.xlu2 %55  }
  0x74   :  { %v8_v19 = vpop.permute.xlu0 %7   ;;  %v20_v20 = vpop.permute.xlu1 %19  }
  0x75   :  { %10 = vst.msk [vmem:[#allocation0] sm:$0x1] %vm9_vm1, %v8_v19   ;;  %v74_v21 = vpop.permute.xlu2 %73  }
  0x7c   :  { %v14_v22 = vpop.permute.xlu0 %13   ;;  %v26_v23 = vpop.permute.xlu1 %25  }
  0x7d   :  { %16 = vst.msk [vmem:[#allocation0] sm:$0x1] %vm15_vm2, %v14_v22   ;;  %v92_v24 = vpop.permute.xlu2 %91  }
  0x7e   :  { %22 = vst.msk [vmem:[#allocation0] sm:$0x1] %vm21_vm3, %v20_v20  }
  0x7f   :  { %28 = vst.msk [vmem:[#allocation0] sm:$0x1] %vm27_vm4, %v26_v23  }
  0x80   :  { %34 = vst.msk [vmem:[#allocation0] sm:$0x1] %vm33_vm5, %v32_v16  }
  0x81   :  { %40 = vst.msk [vmem:[#allocation0] sm:$0x1] %vm39_vm6, %v38_v17  }
  0x84   :  { %v44_v25 = vpop.permute.xlu0 %43   ;;  %v50_v26 = vpop.permute.xlu1 %49  }
  0x85   :  { %46 = vst.msk [vmem:[#allocation0] sm:$0x1] %vm45_vm7, %v44_v25  }
  0x86   :  { %52 = vst.msk [vmem:[#allocation0] sm:$0x1] %vm51_vm8, %v50_v26  }
  0x87   :  { %58 = vst.msk [vmem:[#allocation0] sm:$0x1] %vm57_vm9, %v56_v18  }
  0x8c   :  { %v62_v27 = vpop.permute.xlu0 %61   ;;  %v68_v28 = vpop.permute.xlu1 %67  }
  0x8d   :  { %64 = vst.msk [vmem:[#allocation0] sm:$0x1] %vm63_vm10, %v62_v27  }
  0x8e   :  { %70 = vst.msk [vmem:[#allocation0] sm:$0x1] %vm69_vm11, %v68_v28  }
  0x8f   :  { %76 = vst.msk [vmem:[#allocation0] sm:$0x1] %vm75_vm12, %v74_v21  }
  0x94   :  { %v80_v29 = vpop.permute.xlu0 %79   ;;  %v86_v30 = vpop.permute.xlu1 %85  }
  0x95   :  { %82 = vst.msk [vmem:[#allocation0] sm:$0x1] %vm81_vm13, %v80_v29  }
  0x96   :  { %88 = vst.msk [vmem:[#allocation0] sm:$0x1] %vm87_vm14, %v86_v30  }
  0x97   :  { %94 = vst.msk [vmem:[#allocation0] sm:$0x1] %vm93_vm15, %v92_v24  }
  0x9e   :  { %v97_v31 = vld [vmem:[#allocation0] sm:$0x1] }
  0x9f   :  { %100 = vst [vmem:[%s208_s1] sm:$0x1] %v97_v31 }

// kernel: quant_model_forward.1
= control target key start
LH: loop header
LB: loop body
LE: loop exit
PB: predicated region body
PF: predicated region fallthrough
CT: control target
= control target key end

     0   :  { %s2920_s9 = smov 64   ;;  %s3629_s0 = inlined_call_operand.vmem [shape: f32[32,64], index: 0, kind: input, shape index: {}]   ;;  %s3630_s1 = inlined_call_operand.vmem [shape: bf16[192,128], index: 1, kind: input, shape index: {}]   ;;  %s3631_s2 = inlined_call_operand.vmem [shape: f32[1,128], index: 2, kind: input, shape index: {}]   ;;  %s3632_s3 = inlined_call_operand.vmem [shape: bf16[384,128], index: 3, kind: input, shape index: {}]   ;;  %s3633_s4 = inlined_call_operand.vmem [shape: f32[1,128], index: 4, kind: input, shape index: {}]   ;;  %s3634_s5 = inlined_call_operand.vmem [shape: bf16[2048,128], index: 5, kind: input, shape index: {}]   ;;  %s3635_s6 = inlined_call_operand.vmem [shape: f32[1,128], index: 6, kind: input, shape index: {}]   ;;  %s3636_s7 = inlined_call_operand.hbm [shape: f32[2,128], index: 7, kind: output, shape index: {}]  }
   0x1   :  { %v41_v0 = vld [vmem:[%s3629_s0] sm:$0xff]  ;;  %v42_v1 = vld [vmem:[%s3629_s0 + $0x8] sm:$0xff]  ;;  %v2640_v3 = vld [vmem:[%s3630_s1 + $0x38] sm:$0xff] }
   0x2   :  { %v2875_v2 = vpack.i.bf16 %v42_v1, %v41_v0  ;;  %v2644_v4 = vld [vmem:[%s3630_s1 + $0x58] sm:$0xff]  ;;  %218 = vmatpush.bf16.msra.mxu0 %v2640_v3  ;;  %v2639_v5 = vld [vmem:[%s3630_s1 + $0x30] sm:$0xff] }
   0x3   :  { %v43_v6 = vld [vmem:[%s3629_s0 + $0x10] sm:$0xff]  ;;  %v44_v7 = vld [vmem:[%s3629_s0 + $0x18] sm:$0xff]  ;;  %241 = vmatpush.bf16.msra.mxu1 %v2644_v4 }
   0x4   :  { %2876 = vrot.lane.b32.xlu0 %v2875_v2, %s2920_s9  ;;  %v2643_v8 = vld [vmem:[%s3630_s1 + $0x50] sm:$0xff] }
   0x5   :  { %12 = vsyncpa [#allocation3], 0  ;;  %v2880_v9 = vpack.i.bf16 %v44_v7, %v43_v6  ;;  %v2638_v10 = vld [vmem:[%s3630_s1 + $0x28] sm:$0xff]  ;;  %v2637_v12 = vld [vmem:[%s3630_s1 + $0x20] sm:$0xff]  ;;  %v28_v17 = vlaneseq  ;;  %v67_v18 = vrot.slane %v42_v1, 2  ;;  %v66_v19 = vrot.slane %v41_v0, 2 }
   0x6   :  { %219 = vmatpush.bf16.msra.mxu0 %v2639_v5  ;;  %v2642_v11 = vld [vmem:[%s3630_s1 + $0x48] sm:$0xff]  ;;  %v2641_v13 = vld [vmem:[%s3630_s1 + $0x40] sm:$0xff]  ;;  %v2636_v14 = vld [vmem:[%s3630_s1 + $0x18] sm:$0xff]  ;;  %v68_v20 = vrot.slane %v43_v6, 2  ;;  %v46_v22 = vrot.slane %v42_v1, 6  ;;  %v45_v23 = vrot.slane %v41_v0, 6 }
   0x7   :  { %242 = vmatpush.bf16.msra.mxu1 %v2643_v8  ;;  %v2635_v15 = vld [vmem:[%s3630_s1 + $0x10] sm:$0xff]  ;;  %v2634_v16 = vld [vmem:[%s3630_s1 + $0x8] sm:$0xff]  ;;  %v3009_v21 = vshrl.u32 %v28_v17, 7  ;;  %v48_v24 = vrot.slane %v44_v7, 6  ;;  %vm103_vm1 = vcmask 523264   ;;  %v2633_v28 = vld [vmem:[%s3630_s1] sm:$0xff] }
   0x8   :  { %v69_v31 = vrot.slane %v44_v7, 2  ;;  %v47_v32 = vrot.slane %v43_v6, 6  ;;  %v2885_v59 = vld [vmem:[%s3631_s2] ss:$0 sm:$0xff]  ;;  %vm2922_vm14 = vmmov 1   ;;  %s2923_s19 = smov [#allocation2]  }
   0x9   :  { %vm70_vm0 = vcmp.lt.s32.totalorder %v3009_v21, 6  ;;  %vm49_vm2 = vcmp.lt.s32.totalorder %v3009_v21, 2  ;;  %v3026_v33 = vadd.s32 24, %v3009_v21  ;;  %vm33_vm4 = vcmp.ge.s32.totalorder %v3009_v21, 2  ;;  %s1958_s20 = sshll.u32 %s2923_s19, 4  ;;  %s1960_s22 = sshll.u32 %s3636_s7, 4  ;;  %s1959_s20 = int_to_ptr.vmem [resolvable:$true] %s1958_s20  ;;  %s1961_s22 = int_to_ptr.hbm [resolvable:$true] %s1960_s22 }
   0xa   :  { %220 = vmatpush.bf16.msra.mxu0 %v2638_v10  ;;  %v72_v25 = vsel %vm70_vm0, %v67_v18, %v68_v20  ;;  %v73_v26 = vsel %vm70_vm0, %v66_v19, %v67_v18  ;;  %v52_v29 = vsel %vm49_vm2, %v45_v23, %v46_v22  ;;  %v53_v30 = vsel %vm49_vm2, %v48_v24, %v45_v23  ;;  %vm2115_vm15 = vmpackc.low %vm2922_vm14, %vm33_vm4 }
   0xb   :  { %243 = vmatpush.bf16.msra.mxu1 %v2642_v11  ;;  %v109_v27 = vpack.c.bf16 %v72_v25, %v73_v26  ;;  %v71_v34 = vsel %vm70_vm0, %v68_v20, %v69_v31  ;;  %v74_v35 = vsel %vm70_vm0, %v69_v31, %v66_v19  ;;  %v50_v36 = vsel %vm49_vm2, %v47_v32, %v48_v24  ;;  %v2659_v31 = vld [vmem:[%s3632_s3 + $0x70] sm:$0xff] }
   0xc   :  { %2881 = vrot.lane.b32.xlu0 %v2880_v9, %s2920_s9  ;;  %v51_v37 = vsel %vm49_vm2, %v46_v22, %v47_v32  ;;  %vm40_vm3 = vcmp.lt.s32.totalorder %v3026_v33, 30  ;;  %v62_v41 = vsel %vm33_vm4, %v53_v30, 0.0  ;;  %v2668_v30 = vld [vmem:[%s3632_s3 + $0xb8] sm:$0xff]  ;;  %v2651_v32 = vld [vmem:[%s3632_s3 + $0x30] sm:$0xff] }
   0xd   :  { %v86_v38 = vsel %vm40_vm3, %v74_v35, 0.0  ;;  %v2658_v35 = vld [vmem:[%s3632_s3 + $0x68] sm:$0xff] }
   0xe   :  { %221 = vmatpush.bf16.msra.mxu0 %v2637_v12  ;;  %v111_v39 = vpack.c.bf16 %v86_v38, %v71_v34  ;;  %v2667_v34 = vld [vmem:[%s3632_s3 + $0xb0] sm:$0xff] }
   0xf   :  { %244 = vmatpush.bf16.msra.mxu1 %v2641_v13  ;;  %v2921_v13 = vmov 255.0  }
  0x10   :  { %2888 = vrcp.f32 %v2921_v13 }
  0x12   :  { %222 = vmatpush.bf16.msra.mxu0 %v2636_v14  ;;  %2017 = vmatmul.msk.bf16.vlgmr.msra.gmra.mxu1 %vm103_vm1, %v109_v27 }
  0x13   :  { %585 = vmatpush.bf16.msrb.mxu1 %v2668_v30 }
  0x16   :  { %223 = vmatpush.bf16.msra.mxu0 %v2635_v15  ;;  %v2889_v14 = vpop.eup %2888 }
  0x17   :  { %v273_v15 = vmul.f32 255.0, %v2889_v14  ;;  %vm277_vm5 = vweird.f32 %v2889_v14  ;;  %586 = vmatpush.bf16.msrb.mxu1 %v2667_v34 }
  0x1a   :  { %224 = vmatpush.bf16.msra.mxu0 %v2634_v16  ;;  %v274_v16 = vsub.f32 1.0, %v273_v15 }
  0x1c   :  { %v275_v20 = vmul.f32 %v2889_v14, %v274_v16 }
  0x1e   :  { %225 = vmatpush.bf16.msra.mxu0 %v2633_v28  ;;  %v276_v24 = vadd.f32 %v2889_v14, %v275_v20  ;;  %v2660_v28 = vld [vmem:[%s3632_s3 + $0x78] sm:$0xff] }
  0x1f   :  { %566 = vmatpush.bf16.msra.mxu3 %v2660_v28 }
  0x20   :  { %v278_v27 = vsel %vm277_vm5, %v2889_v14, %v276_v24 }
  0x22   :  { %2018 = vmatmul.msk.bf16.gmra.mxu1 %vm103_vm1, %v111_v39 }
  0x23   :  { %567 = vmatpush.bf16.msra.mxu3 %v2659_v31 }
  0x27   :  { %568 = vmatpush.bf16.msra.mxu3 %v2658_v35 }
  0x76   :  { %v2877_v40 = vpop.permute.xlu0 %2876 }
  0x77   :  { %v2879_v42 = vunpack.i.h.bf16 %v2877_v40  ;;  %v2878_v43 = vunpack.i.l.bf16 %v2877_v40 }
  0x79   :  { %v104_v44 = vsel %vm103_vm1, %v62_v41, %v2878_v43  ;;  %v105_v45 = vsel %vm103_vm1, %v52_v29, %v2879_v42  ;;  %v2652_v29 = vld [vmem:[%s3632_s3 + $0x38] sm:$0xff] }
  0x7a   :  { %v108_v46 = vpack.c.bf16 %v105_v45, %v104_v44  ;;  %547 = vmatpush.bf16.msra.mxu2 %v2652_v29 }
  0x7c   :  { %226 = vmatmul.bf16.vlgmr.msra.gmra.mxu0 %v108_v46 }
  0x7e   :  { %v2882_v47 = vpop.permute.xlu0 %2881  ;;  %548 = vmatpush.bf16.msra.mxu2 %v2651_v32 }
  0x7f   :  { %v2884_v48 = vunpack.i.h.bf16 %v2882_v47  ;;  %v2883_v49 = vunpack.i.l.bf16 %v2882_v47  ;;  %v2650_v47 = vld [vmem:[%s3632_s3 + $0x28] sm:$0xff] }
  0x81   :  { %v106_v50 = vsel %vm103_vm1, %v51_v37, %v2883_v49  ;;  %v107_v51 = vsel %vm103_vm1, %v50_v36, %v2884_v48  ;;  %v2666_v48 = vld [vmem:[%s3632_s3 + $0xa8] sm:$0xff]  ;;  %v2657_v49 = vld [vmem:[%s3632_s3 + $0x60] sm:$0xff]  ;;  %vm2118_vm1 = vmpackc.low %vm40_vm3, %vm2922_vm14 }
  0x82   :  { %v110_v52 = vpack.c.bf16 %v107_v51, %v106_v50  ;;  %549 = vmatpush.bf16.msra.mxu2 %v2650_v47  ;;  %587 = vmatpush.bf16.msrb.mxu1 %v2666_v48  ;;  %v2649_v50 = vld [vmem:[%s3632_s3 + $0x20] sm:$0xff] }
  0x83   :  { %569 = vmatpush.bf16.msra.mxu3 %v2657_v49  ;;  %v2665_v51 = vld [vmem:[%s3632_s3 + $0xa0] sm:$0xff] }
  0x86   :  { %550 = vmatpush.bf16.msra.mxu2 %v2649_v50  ;;  %588 = vmatpush.bf16.msrb.mxu1 %v2665_v51 }
  0x8c   :  { %231 = vmatmul.bf16.gmra.mxu0 %v110_v52  ;;  %v2656_v52 = vld [vmem:[%s3632_s3 + $0x58] sm:$0xff] }
  0x8d   :  { %570 = vmatpush.bf16.msra.mxu3 %v2656_v52 }
  0x8f   :  { %v246_v53 = vpop.f32.mrf.mxu1 }
  0x97   :  { %v248_v55 = vpop.f32.mrf.mxu1 }
  0x9f   :  { %v251_v57 = vpop.f32.mrf.mxu1 }
  0xa7   :  { %v253_v4 = vpop.f32.mrf.mxu1 }
  0xf9   :  { %v227_v54 = vpop.f32.mrf.mxu0 }
  0xfa   :  { %v228_v61 = vadd.f32 %v2885_v59, %v227_v54  ;;  %v2664_v54 = vld [vmem:[%s3632_s3 + $0x98] sm:$0xff] }
  0xfb   :  { %589 = vmatpush.bf16.msrb.mxu1 %v2664_v54 }
  0xfc   :  { %v3052_v1 = vadd.f32 %v246_v53, %v228_v61  ;;  %v2648_v53 = vld [vmem:[%s3632_s3 + $0x18] sm:$0xff]  ;;  %v2653_v61 = vld [vmem:[%s3632_s3 + $0x40] sm:$0xff] }
  0xfd   :  { %551 = vmatpush.bf16.msra.mxu2 %v2648_v53 }
  0xfe   :  { %v256_v7 = vmax.f32 %v3052_v1, 0.0 }
 0x101   :  { %v229_v56 = vpop.f32.mrf.mxu0 }
 0x102   :  { %v230_v60 = vadd.f32 %v2885_v59, %v229_v56  ;;  %v2647_v56 = vld [vmem:[%s3632_s3 + $0x10] sm:$0xff] }
 0x103   :  { %552 = vmatpush.bf16.msra.mxu2 %v2647_v56 }
 0x104   :  { %v3050_v63 = vadd.f32 %v248_v55, %v230_v60  ;;  %v2655_v55 = vld [vmem:[%s3632_s3 + $0x50] sm:$0xff]  ;;  %v2662_v60 = vld [vmem:[%s3632_s3 + $0x88] sm:$0xff] }
 0x105   :  { %571 = vmatpush.bf16.msra.mxu3 %v2655_v55 }
 0x106   :  { %v257_v5 = vmax.f32 %v3050_v63, 0.0 }
 0x108   :  { %v260_v10 = vmax.f32 %v256_v7, %v257_v5 }
 0x109   :  { %v232_v58 = vpop.f32.mrf.mxu0 }
 0x10a   :  { %v233_v62 = vadd.f32 %v2885_v59, %v232_v58  ;;  %v2654_v58 = vld [vmem:[%s3632_s3 + $0x48] sm:$0xff] }
 0x10b   :  { %572 = vmatpush.bf16.msra.mxu3 %v2654_v58 }
 0x10c   :  { %v3054_v2 = vadd.f32 %v251_v57, %v233_v62  ;;  %v2663_v57 = vld [vmem:[%s3632_s3 + $0x90] sm:$0xff]  ;;  %v2645_v62 = vld [vmem:[%s3632_s3] sm:$0xff] }
 0x10d   :  { %590 = vmatpush.bf16.msrb.mxu1 %v2663_v57 }
 0x10e   :  { %v258_v8 = vmax.f32 %v3054_v2, 0.0 }
 0x10f   :  { %573 = vmatpush.bf16.msra.mxu3 %v2653_v61 }
 0x111   :  { %v234_v0 = vpop.f32.mrf.mxu0  ;;  %591 = vmatpush.bf16.msrb.mxu1 %v2662_v60 }
 0x112   :  { %v235_v3 = vadd.f32 %v2885_v59, %v234_v0  ;;  %v2646_v59 = vld [vmem:[%s3632_s3 + $0x8] sm:$0xff]  ;;  %v2661_v0 = vld [vmem:[%s3632_s3 + $0x80] sm:$0xff] }
 0x113   :  { %553 = vmatpush.bf16.msra.mxu2 %v2646_v59 }
 0x114   :  { %v3057_v6 = vadd.f32 %v253_v4, %v235_v3 }
 0x115   :  { %592 = vmatpush.bf16.msrb.mxu1 %v2661_v0 }
 0x116   :  { %v259_v9 = vmax.f32 %v3057_v6, 0.0 }
 0x117   :  { %554 = vmatpush.bf16.msra.mxu2 %v2645_v62 }
 0x118   :  { %v261_v11 = vmax.f32 %v258_v8, %v259_v9 }
 0x11a   :  { %v262_v12 = vmax.f32 %v260_v10, %v261_v11 }
 0x11c   :  { %263 = vmax.xlane.f32.xlu1 %v262_v12 }
 0x18f   :  { %v264_v17 = vpop.xlane.xlu1 %263 }
 0x190   :  { %v265_v18 = vrot.slane %v264_v17, 4 }
 0x192   :  { %v266_v19 = vmax.f32 %v264_v17, %v265_v18 }
 0x194   :  { %v267_v22 = vrot.slane %v266_v19, 2 }
 0x196   :  { %v268_v23 = vmax.f32 %v266_v19, %v267_v22 }
 0x198   :  { %v269_v25 = vrot.slane %v268_v23, 1 }
 0x19a   :  { %v270_v26 = vmax.f32 %v268_v23, %v269_v25 }
 0x19c   :  { %2797 = vpush %v270_v26 }
 0x19d   :  { %2799 = vpush %v278_v27 }
 0x1cd   :  { %s2798_s0 = spop %2797 }
 0x1ce   :  { %s3091_s24 = spop %2799 }
 0x1cf   :  { %s280_s25 = smul.f32 %s3091_s24, %s2798_s0 }
 0x1d1   :  { %p281_p0 = scmp.le.f32.partialorder %s280_s25, 1e-08 }
 0x1d3   :  { %s3638_s25 = smov (%p281_p0, %s280_s25), 1.0 }
 0x1d4   :  { %v3094_v36 = vstv %s3638_s25 }
 0x1d5   :  { %2890 = vrcp.f32 %v3094_v36  ;;  %v295_v40 = vand.u32 2147483648, %v3094_v36  ;;  %v293_v42 = vand.u32 2147483647, %v3094_v36  ;;  %vm289_vm7 = vweird.f32 %v3094_v36 }
 0x1d7   :  { %v296_v44 = vor.u32 1.1754944e-38, %v295_v40  ;;  %vm294_vm9 = vcmp.eq.f32.partialorder %v293_v42, 8.507059e+37 }
 0x1db   :  { %v2891_v37 = vpop.eup %2890 }
 0x1dc   :  { %v285_v38 = vmul.f32 %v2891_v37, %v3094_v36  ;;  %vm290_vm6 = vweird.f32 %v2891_v37 }
 0x1dd   :  { %vm291_vm8 = vmor %vm289_vm7, %vm290_vm6 }
 0x1de   :  { %v286_v39 = vsub.f32 1.0, %v285_v38 }
 0x1e0   :  { %v287_v41 = vmul.f32 %v2891_v37, %v286_v39 }
 0x1e2   :  { %v288_v43 = vadd.f32 %v2891_v37, %v287_v41 }
 0x1e4   :  { %v292_v45 = vsel %vm291_vm8, %v2891_v37, %v288_v43 }
 0x1e5   :  { %v297_v46 = vsel %vm294_vm9, %v296_v44, %v292_v45 }
 0x1e6   :  { %2801 = vpush %v297_v46 }
 0x217   :  { %s2802_s2 = spop %2801 }
 0x218   :  { %v299_v3 = vstv %s2802_s2 }
 0x219   :  { %v300_v4 = vmul.f32 %v299_v3, %v256_v7  ;;  %v301_v10 = vmul.f32 %v299_v3, %v257_v5  ;;  %v302_v11 = vmul.f32 %v299_v3, %v258_v8  ;;  %v303_v12 = vmul.f32 %v299_v3, %v259_v9 }
 0x21b   :  { %v2805_v13 = vcvt.f32.s32 %v300_v4  ;;  %v2813_v14 = vcvt.f32.s32 %v301_v10  ;;  %v2821_v15 = vcvt.f32.s32 %v302_v11  ;;  %v2808_v17 = vand.u32 2147483648, %v300_v4 }
 0x21c   :  { %v2829_v19 = vcvt.f32.s32 %v303_v12  ;;  %v2816_v20 = vand.u32 2147483648, %v301_v10  ;;  %v2819_v22 = vand.u32 2147483647, %v302_v11  ;;  %v2803_v7 = vand.u32 2147483647, %v300_v4 }
 0x21d   :  { %v2806_v16 = vcvt.s32.f32 %v2805_v13  ;;  %v2814_v18 = vcvt.s32.f32 %v2813_v14  ;;  %v2822_v1 = vcvt.s32.f32 %v2821_v15  ;;  %v2811_v24 = vand.u32 2147483647, %v301_v10 }
 0x21e   :  { %v2830_v5 = vcvt.s32.f32 %v2829_v19  ;;  %v2824_v8 = vand.u32 2147483648, %v302_v11  ;;  %v2827_v25 = vand.u32 2147483647, %v303_v12  ;;  %v2832_v9 = vand.u32 2147483648, %v303_v12  ;;  %v2886_v19 = vld [vmem:[%s3633_s4] ss:$0 sm:$0xff] }
 0x21f   :  { %v2807_v23 = vand.u32 2147483647, %v2806_v16  ;;  %v2815_v63 = vand.u32 2147483647, %v2814_v18  ;;  %v2823_v2 = vand.u32 2147483647, %v2822_v1 }
 0x220   :  { %v2831_v6 = vand.u32 2147483647, %v2830_v5  ;;  %vm2804_vm10 = vcmp.lt.f32.partialorder %v2803_v7, 8388608.0  ;;  %vm2812_vm11 = vcmp.lt.f32.partialorder %v2811_v24, 8388608.0  ;;  %vm2820_vm12 = vcmp.lt.f32.partialorder %v2819_v22, 8388608.0 }
 0x221   :  { %v2809_v26 = vor.u32 %v2808_v17, %v2807_v23  ;;  %v2817_v27 = vor.u32 %v2816_v20, %v2815_v63  ;;  %v2825_v28 = vor.u32 %v2824_v8, %v2823_v2  ;;  %vm2828_vm13 = vcmp.lt.f32.partialorder %v2827_v25, 8388608.0 }
 0x222   :  { %v2833_v29 = vor.u32 %v2832_v9, %v2831_v6 }
 0x223   :  { %v2810_v30 = vsel %vm2804_vm10, %v2809_v26, %v300_v4  ;;  %v2818_v31 = vsel %vm2812_vm11, %v2817_v27, %v301_v10  ;;  %v2826_v32 = vsel %vm2820_vm12, %v2825_v28, %v302_v11 }
 0x224   :  { %v308_v34 = vmax.f32 %v2810_v30, 0.0  ;;  %v309_v35 = vmax.f32 %v2818_v31, 0.0  ;;  %v2834_v37 = vsel %vm2828_vm13, %v2833_v29, %v303_v12  ;;  %v310_v38 = vmax.f32 %v2826_v32, 0.0 }
 0x225   :  { %v311_v39 = vmax.f32 %v2834_v37, 0.0 }
 0x226   :  { %v312_v40 = vmin.f32 %v308_v34, 255.0  ;;  %v313_v41 = vmin.f32 %v309_v35, 255.0  ;;  %v314_v42 = vmin.f32 %v310_v38, 255.0 }
 0x227   :  { %v315_v43 = vmin.f32 %v311_v39, 255.0 }
 0x228   :  { %v317_v44 = vmul.f32 %v312_v40, %v3094_v36  ;;  %v318_v45 = vmul.f32 %v313_v41, %v3094_v36  ;;  %v319_v46 = vmul.f32 %v314_v42, %v3094_v36 }
 0x229   :  { %v320_v48 = vmul.f32 %v315_v43, %v3094_v36 }
 0x22a   :  { %v346_v47 = vpack.c.bf16 %v318_v45, %v317_v44  ;;  %v321_v49 = vrot.slane %v317_v44, 6  ;;  %v322_v50 = vrot.slane %v318_v45, 6  ;;  %v333_v51 = vrot.slane %v317_v44, 2 }
 0x22b   :  { %v334_v52 = vrot.slane %v318_v45, 2  ;;  %v335_v53 = vrot.slane %v319_v46, 2  ;;  %v324_v54 = vrot.slane %v320_v48, 6  ;;  %v336_v60 = vrot.slane %v320_v48, 2  ;;  %v2676_v45 = vld [vmem:[%s3634_s5 + $0x38] sm:$0xff] }
 0x22c   :  { %574 = vmatmul.bf16.vlgmr.msra.gmra.mxu3 %v346_v47  ;;  %v327_v55 = vsel %vm49_vm2, %v321_v49, %v322_v50  ;;  %v323_v61 = vrot.slane %v319_v46, 6  ;;  %v349_v62 = vpack.c.bf16 %v320_v48, %v319_v46  ;;  %v2684_v46 = vld [vmem:[%s3634_s5 + $0x78] sm:$0xff]  ;;  %814 = vmatpush.bf16.msrb.mxu2 %v2676_v45  ;;  %v2705_v45 = vld [vmem:[%s3634_s5 + $0x120] sm:$0xff] }
 0x22d   :  { %v338_v56 = vsel %vm70_vm0, %v334_v52, %v335_v53  ;;  %v339_v57 = vsel %vm70_vm0, %v333_v51, %v334_v52  ;;  %v328_v58 = vsel %vm49_vm2, %v324_v54, %v321_v49  ;;  %v337_v0 = vsel %vm70_vm0, %v335_v53, %v336_v60  ;;  %v2692_v47 = vld [vmem:[%s3634_s5 + $0xb8] sm:$0xff]  ;;  %753 = vmatpush.bf16.msrb.mxu0 %v2684_v46  ;;  %v2675_v49 = vld [vmem:[%s3634_s5 + $0x30] sm:$0xff]  ;;  %v2674_v53 = vld [vmem:[%s3634_s5 + $0x28] sm:$0xff] }
 0x22e   :  { %v347_v36 = vpack.c.bf16 %v338_v56, %v339_v57  ;;  %v2116_v59 = vpack.c.bf16 %v327_v55, %v328_v58  ;;  %v340_v3 = vsel %vm70_vm0, %v336_v60, %v333_v51  ;;  %v325_v4 = vsel %vm49_vm2, %v323_v61, %v324_v54  ;;  %v2700_v48 = vld [vmem:[%s3634_s5 + $0xf8] sm:$0xff]  ;;  %893 = vmatpush.bf16.msrb.mxu3 %v2692_v47  ;;  %v2691_v51 = vld [vmem:[%s3634_s5 + $0xb0] sm:$0xff]  ;;  %v2682_v54 = vld [vmem:[%s3634_s5 + $0x68] sm:$0xff] }
 0x22f   :  { %v326_v10 = vsel %vm49_vm2, %v322_v50, %v323_v61  ;;  %v2119_v11 = vpack.c.bf16 %v340_v3, %v337_v0  ;;  %v2683_v50 = vld [vmem:[%s3634_s5 + $0x70] sm:$0xff]  ;;  %973 = vmatpush.bf16.msra.mxu1 %v2700_v48  ;;  %v2690_v55 = vld [vmem:[%s3634_s5 + $0xa8] sm:$0xff]  ;;  %v2673_v57 = vld [vmem:[%s3634_s5 + $0x20] sm:$0xff] }
 0x230   :  { %593 = vmatmul.bf16.vlgmr.msrb.gmra.mxu1 %v347_v36  ;;  %2117 = vmatmul.msk.bf16.vlgmr.msra.gmra.mxu2 %vm2115_vm15, %v2116_v59  ;;  %v348_v12 = vpack.c.bf16 %v325_v4, %v326_v10  ;;  %v2699_v52 = vld [vmem:[%s3634_s5 + $0xf0] sm:$0xff]  ;;  %v2698_v56 = vld [vmem:[%s3634_s5 + $0xe8] sm:$0xff]  ;;  %v2681_v58 = vld [vmem:[%s3634_s5 + $0x60] sm:$0xff] }
 0x231   :  { %815 = vmatpush.bf16.msrb.mxu2 %v2675_v49  ;;  %754 = vmatpush.bf16.msrb.mxu0 %v2683_v50  ;;  %v2689_v36 = vld [vmem:[%s3634_s5 + $0xa0] sm:$0xff]  ;;  %v2672_v61 = vld [vmem:[%s3634_s5 + $0x18] sm:$0xff]  ;;  %v2671_v4 = vld [vmem:[%s3634_s5 + $0x10] sm:$0xff] }
 0x232   :  { %894 = vmatpush.bf16.msrb.mxu3 %v2691_v51  ;;  %v2697_v59 = vld [vmem:[%s3634_s5 + $0xe0] sm:$0xff]  ;;  %v2688_v0 = vld [vmem:[%s3634_s5 + $0x98] sm:$0xff]  ;;  %v2679_v10 = vld [vmem:[%s3634_s5 + $0x50] sm:$0xff] }
 0x233   :  { %974 = vmatpush.bf16.msra.mxu1 %v2699_v52  ;;  %v2696_v3 = vld [vmem:[%s3634_s5 + $0xd8] sm:$0xff]  ;;  %v2721_v46 = vld [vmem:[%s3634_s5 + $0x1a0] sm:$0xff]  ;;  %v2711_v52 = vld [vmem:[%s3634_s5 + $0x150] sm:$0xff] }
 0x234   :  { %v2729_v47 = vld [vmem:[%s3634_s5 + $0x1e0] sm:$0xff]  ;;  %v2712_v48 = vld [vmem:[%s3634_s5 + $0x158] sm:$0xff] }
 0x235   :  { %816 = vmatpush.bf16.msrb.mxu2 %v2674_v53  ;;  %755 = vmatpush.bf16.msrb.mxu0 %v2682_v54  ;;  %v2704_v49 = vld [vmem:[%s3634_s5 + $0x118] sm:$0xff]  ;;  %v2703_v53 = vld [vmem:[%s3634_s5 + $0x110] sm:$0xff] }
 0x236   :  { %895 = vmatpush.bf16.msrb.mxu3 %v2690_v55  ;;  %v2720_v50 = vld [vmem:[%s3634_s5 + $0x198] sm:$0xff]  ;;  %v2719_v54 = vld [vmem:[%s3634_s5 + $0x190] sm:$0xff] }
 0x237   :  { %975 = vmatpush.bf16.msra.mxu1 %v2698_v56  ;;  %v2728_v51 = vld [vmem:[%s3634_s5 + $0x1d8] sm:$0xff]  ;;  %v2727_v55 = vld [vmem:[%s3634_s5 + $0x1d0] sm:$0xff]  ;;  %v2710_v56 = vld [vmem:[%s3634_s5 + $0x148] sm:$0xff] }
 0x239   :  { %817 = vmatpush.bf16.msrb.mxu2 %v2673_v57  ;;  %756 = vmatpush.bf16.msrb.mxu0 %v2681_v58  ;;  %v2702_v57 = vld [vmem:[%s3634_s5 + $0x108] sm:$0xff] }
 0x23a   :  { %896 = vmatpush.bf16.msrb.mxu3 %v2689_v36  ;;  %v2718_v58 = vld [vmem:[%s3634_s5 + $0x188] sm:$0xff] }
 0x23b   :  { %976 = vmatpush.bf16.msra.mxu1 %v2697_v59  ;;  %v2726_v36 = vld [vmem:[%s3634_s5 + $0x1c8] sm:$0xff]  ;;  %v2709_v59 = vld [vmem:[%s3634_s5 + $0x140] sm:$0xff] }
 0x23c   :  { %579 = vmatmul.bf16.gmra.mxu3 %v349_v62  ;;  %v2680_v62 = vld [vmem:[%s3634_s5 + $0x58] sm:$0xff] }
 0x23d   :  { %818 = vmatpush.bf16.msrb.mxu2 %v2672_v61  ;;  %757 = vmatpush.bf16.msrb.mxu0 %v2680_v62  ;;  %v2701_v61 = vld [vmem:[%s3634_s5 + $0x100] sm:$0xff] }
 0x23e   :  { %897 = vmatpush.bf16.msrb.mxu3 %v2688_v0  ;;  %v2717_v62 = vld [vmem:[%s3634_s5 + $0x180] sm:$0xff] }
 0x23f   :  { %977 = vmatpush.bf16.msra.mxu1 %v2696_v3  ;;  %v2725_v0 = vld [vmem:[%s3634_s5 + $0x1c0] sm:$0xff] }
 0x240   :  { %2120 = vmatmul.msk.bf16.gmra.mxu1 %vm2118_vm1, %v2119_v11  ;;  %560 = vmatmul.bf16.gmra.mxu2 %v348_v12  ;;  %v2687_v11 = vld [vmem:[%s3634_s5 + $0x90] sm:$0xff] }
 0x241   :  { %v2695_v12 = vld [vmem:[%s3634_s5 + $0xd0] sm:$0xff]  ;;  %819 = vmatpush.bf16.msrb.mxu2 %v2671_v4  ;;  %758 = vmatpush.bf16.msrb.mxu0 %v2679_v10 }
 0x242   :  { %898 = vmatpush.bf16.msrb.mxu3 %v2687_v11 }
 0x243   :  { %978 = vmatpush.bf16.msra.mxu1 %v2695_v12 }
 0x2ad   :  { %v594_v14 = vpop.f32.mrf.mxu1 }
 0x2af   :  { %v575_v13 = vpop.f32.mrf.mxu3 }
 0x2b3   :  { %v556_v15 = vpop.f32.mrf.mxu2 }
 0x2b4   :  { %v557_v33 = vadd.f32 %v2886_v19, %v556_v15  ;;  %v2670_v15 = vld [vmem:[%s3634_s5 + $0x8] sm:$0xff] }
 0x2b5   :  { %v596_v17 = vpop.f32.mrf.mxu1  ;;  %820 = vmatpush.bf16.msrb.mxu2 %v2670_v15 }
 0x2b6   :  { %v576_v63 = vadd.f32 %v575_v13, %v557_v33  ;;  %v2677_v33 = vld [vmem:[%s3634_s5 + $0x40] sm:$0xff] }
 0x2b7   :  { %v577_v16 = vpop.f32.mrf.mxu3 }
 0x2b8   :  { %v3189_v6 = vadd.f32 %v594_v14, %v576_v63 }
 0x2ba   :  { %v604_v30 = vmax.f32 %v3189_v6, 0.0 }
 0x2bb   :  { %v558_v18 = vpop.f32.mrf.mxu2 }
 0x2bc   :  { %v559_v22 = vadd.f32 %v2886_v19, %v558_v18  ;;  %v2694_v18 = vld [vmem:[%s3634_s5 + $0xc8] sm:$0xff] }
 0x2bd   :  { %v599_v1 = vpop.f32.mrf.mxu1  ;;  %979 = vmatpush.bf16.msra.mxu1 %v2694_v18 }
 0x2be   :  { %v578_v23 = vadd.f32 %v577_v16, %v559_v22  ;;  %v2678_v16 = vld [vmem:[%s3634_s5 + $0x48] sm:$0xff] }
 0x2bf   :  { %v580_v20 = vpop.f32.mrf.mxu3  ;;  %759 = vmatpush.bf16.msrb.mxu0 %v2678_v16 }
 0x2c0   :  { %v3187_v2 = vadd.f32 %v596_v17, %v578_v23  ;;  %v2686_v17 = vld [vmem:[%s3634_s5 + $0x88] sm:$0xff]  ;;  %v2685_v23 = vld [vmem:[%s3634_s5 + $0x80] sm:$0xff] }
 0x2c1   :  { %899 = vmatpush.bf16.msrb.mxu3 %v2686_v17 }
 0x2c2   :  { %v605_v28 = vmax.f32 %v3187_v2, 0.0 }
 0x2c3   :  { %v561_v21 = vpop.f32.mrf.mxu2  ;;  %760 = vmatpush.bf16.msrb.mxu0 %v2677_v33 }
 0x2c4   :  { %v562_v7 = vadd.f32 %v2886_v19, %v561_v21  ;;  %v608_v34 = vmax.f32 %v604_v30, %v605_v28 }
 0x2c5   :  { %v601_v27 = vpop.f32.mrf.mxu1  ;;  %900 = vmatpush.bf16.msrb.mxu3 %v2685_v23 }
 0x2c6   :  { %v581_v5 = vadd.f32 %v580_v20, %v562_v7  ;;  %v2716_v7 = vld [vmem:[%s3634_s5 + $0x178] sm:$0xff] }
 0x2c7   :  { %v582_v25 = vpop.f32.mrf.mxu3 }
 0x2c8   :  { %v3191_v9 = vadd.f32 %v599_v1, %v581_v5  ;;  %v2669_v1 = vld [vmem:[%s3634_s5] sm:$0xff] }
 0x2c9   :  { %v2693_v5 = vld [vmem:[%s3634_s5 + $0xc0] sm:$0xff]  ;;  %821 = vmatpush.bf16.msrb.mxu2 %v2669_v1 }
 0x2ca   :  { %v606_v31 = vmax.f32 %v3191_v9, 0.0  ;;  %980 = vmatpush.bf16.msra.mxu1 %v2693_v5 }
 0x2cb   :  { %v563_v24 = vpop.f32.mrf.mxu2 }
 0x2cc   :  { %v564_v8 = vadd.f32 %v2886_v19, %v563_v24  ;;  %v2708_v24 = vld [vmem:[%s3634_s5 + $0x138] sm:$0xff] }
 0x2cd   :  { %1133 = vmatpush.bf16.msra.mxu2 %v2716_v7  ;;  %1052 = vmatpush.bf16.msra.mxu0 %v2708_v24  ;;  %v2748_v7 = vld [vmem:[%s3634_s5 + $0x278] sm:$0xff] }
 0x2ce   :  { %v583_v26 = vadd.f32 %v582_v25, %v564_v8  ;;  %v2724_v25 = vld [vmem:[%s3634_s5 + $0x1b8] sm:$0xff] }
 0x2cf   :  { %1213 = vmatpush.bf16.msra.mxu3 %v2724_v25  ;;  %v2740_v24 = vld [vmem:[%s3634_s5 + $0x238] sm:$0xff] }
 0x2d0   :  { %v3194_v29 = vadd.f32 %v601_v27, %v583_v26  ;;  %v2732_v26 = vld [vmem:[%s3634_s5 + $0x1f8] sm:$0xff] }
 0x2d1   :  { %1293 = vmatpush.bf16.msrb.mxu1 %v2732_v26  ;;  %v2756_v25 = vld [vmem:[%s3634_s5 + $0x2b8] sm:$0xff] }
 0x2d2   :  { %v607_v32 = vmax.f32 %v3194_v29, 0.0  ;;  %v2764_v26 = vld [vmem:[%s3634_s5 + $0x2f8] sm:$0xff] }
 0x2d4   :  { %v609_v35 = vmax.f32 %v606_v31, %v607_v32 }
 0x2d6   :  { %v610_v37 = vmax.f32 %v608_v34, %v609_v35  ;;  %v2715_v35 = vld [vmem:[%s3634_s5 + $0x170] sm:$0xff] }
 0x2d7   :  { %1134 = vmatpush.bf16.msra.mxu2 %v2715_v35 }
 0x2d8   :  { %611 = vmax.xlane.f32.xlu1 %v610_v37  ;;  %v2707_v37 = vld [vmem:[%s3634_s5 + $0x130] sm:$0xff] }
 0x2d9   :  { %1053 = vmatpush.bf16.msra.mxu0 %v2707_v37  ;;  %v2739_v37 = vld [vmem:[%s3634_s5 + $0x230] sm:$0xff] }
 0x34b   :  { %v612_v38 = vpop.xlane.xlu1 %611 }
 0x34c   :  { %v613_v39 = vrot.slane %v612_v38, 4 }
 0x34e   :  { %v614_v40 = vmax.f32 %v612_v38, %v613_v39  ;;  %v2723_v38 = vld [vmem:[%s3634_s5 + $0x1b0] sm:$0xff] }
 0x34f   :  { %v2731_v39 = vld [vmem:[%s3634_s5 + $0x1f0] sm:$0xff]  ;;  %1214 = vmatpush.bf16.msra.mxu3 %v2723_v38 }
 0x350   :  { %v615_v41 = vrot.slane %v614_v40, 2  ;;  %1294 = vmatpush.bf16.msrb.mxu1 %v2731_v39  ;;  %v2755_v38 = vld [vmem:[%s3634_s5 + $0x2b0] sm:$0xff] }
 0x351   :  { %v2763_v39 = vld [vmem:[%s3634_s5 + $0x2f0] sm:$0xff] }
 0x352   :  { %v616_v42 = vmax.f32 %v614_v40, %v615_v41  ;;  %v2714_v40 = vld [vmem:[%s3634_s5 + $0x168] sm:$0xff] }
 0x353   :  { %1135 = vmatpush.bf16.msra.mxu2 %v2714_v40  ;;  %v2706_v41 = vld [vmem:[%s3634_s5 + $0x128] sm:$0xff] }
 0x354   :  { %v617_v43 = vrot.slane %v616_v42, 1  ;;  %1054 = vmatpush.bf16.msra.mxu0 %v2706_v41  ;;  %v2746_v40 = vld [vmem:[%s3634_s5 + $0x268] sm:$0xff] }
 0x356   :  { %v618_v44 = vmax.f32 %v616_v42, %v617_v43  ;;  %v2722_v42 = vld [vmem:[%s3634_s5 + $0x1a8] sm:$0xff] }
 0x357   :  { %v2730_v43 = vld [vmem:[%s3634_s5 + $0x1e8] sm:$0xff]  ;;  %1215 = vmatpush.bf16.msra.mxu3 %v2722_v42 }
 0x358   :  { %2835 = vpush %v618_v44  ;;  %v2713_v44 = vld [vmem:[%s3634_s5 + $0x160] sm:$0xff]  ;;  %1295 = vmatpush.bf16.msrb.mxu1 %v2730_v43  ;;  %1055 = vmatpush.bf16.msra.mxu0 %v2705_v45  ;;  %v2738_v43 = vld [vmem:[%s3634_s5 + $0x228] sm:$0xff] }
 0x359   :  { %1136 = vmatpush.bf16.msra.mxu2 %v2713_v44  ;;  %v2754_v45 = vld [vmem:[%s3634_s5 + $0x2a8] sm:$0xff] }
 0x35b   :  { %1216 = vmatpush.bf16.msra.mxu3 %v2721_v46  ;;  %v2762_v46 = vld [vmem:[%s3634_s5 + $0x2e8] sm:$0xff] }
 0x35c   :  { %1296 = vmatpush.bf16.msrb.mxu1 %v2729_v47  ;;  %1056 = vmatpush.bf16.msra.mxu0 %v2704_v49 }
 0x35d   :  { %1137 = vmatpush.bf16.msra.mxu2 %v2712_v48  ;;  %v2745_v48 = vld [vmem:[%s3634_s5 + $0x260] sm:$0xff] }
 0x35f   :  { %1217 = vmatpush.bf16.msra.mxu3 %v2720_v50 }
 0x360   :  { %1297 = vmatpush.bf16.msrb.mxu1 %v2728_v51  ;;  %1057 = vmatpush.bf16.msra.mxu0 %v2703_v53  ;;  %v2737_v51 = vld [vmem:[%s3634_s5 + $0x220] sm:$0xff] }
 0x361   :  { %1138 = vmatpush.bf16.msra.mxu2 %v2711_v52  ;;  %v2753_v52 = vld [vmem:[%s3634_s5 + $0x2a0] sm:$0xff] }
 0x362   :  { %v2761_v53 = vld [vmem:[%s3634_s5 + $0x2e0] sm:$0xff] }
 0x363   :  { %1218 = vmatpush.bf16.msra.mxu3 %v2719_v54 }
 0x364   :  { %1298 = vmatpush.bf16.msrb.mxu1 %v2727_v55  ;;  %1058 = vmatpush.bf16.msra.mxu0 %v2702_v57  ;;  %v2744_v55 = vld [vmem:[%s3634_s5 + $0x258] sm:$0xff] }
 0x365   :  { %1139 = vmatpush.bf16.msra.mxu2 %v2710_v56  ;;  %v2736_v57 = vld [vmem:[%s3634_s5 + $0x218] sm:$0xff] }
 0x367   :  { %1219 = vmatpush.bf16.msra.mxu3 %v2718_v58  ;;  %v2752_v58 = vld [vmem:[%s3634_s5 + $0x298] sm:$0xff] }
 0x368   :  { %1299 = vmatpush.bf16.msrb.mxu1 %v2726_v36  ;;  %1059 = vmatpush.bf16.msra.mxu0 %v2701_v61 }
 0x369   :  { %1140 = vmatpush.bf16.msra.mxu2 %v2709_v59 }
 0x36b   :  { %1220 = vmatpush.bf16.msra.mxu3 %v2717_v62  ;;  %v2760_v62 = vld [vmem:[%s3634_s5 + $0x2d8] sm:$0xff] }
 0x36c   :  { %1300 = vmatpush.bf16.msrb.mxu1 %v2725_v0  ;;  %v2743_v0 = vld [vmem:[%s3634_s5 + $0x250] sm:$0xff] }
 0x389   :  { %s2836_s8 = spop %2835 }
 0x38a   :  { %s628_s3 = smul.f32 %s2836_s8, %s3091_s24 }
 0x38c   :  { %p629_p1 = scmp.le.f32.partialorder %s628_s3, 1e-08 }
 0x38e   :  { %s3640_s3 = smov (%p629_p1, %s628_s3), 1.0 }
 0x38f   :  { %v3256_v60 = vstv %s3640_s3 }
 0x390   :  { %2892 = vrcp.f32 %v3256_v60  ;;  %v643_v20 = vand.u32 2147483648, %v3256_v60  ;;  %v641_v22 = vand.u32 2147483647, %v3256_v60  ;;  %vm637_vm2 = vweird.f32 %v3256_v60 }
 0x392   :  { %v644_v8 = vor.u32 1.1754944e-38, %v643_v20  ;;  %vm642_vm4 = vcmp.eq.f32.partialorder %v641_v22, 8.507059e+37 }
 0x396   :  { %v2893_v13 = vpop.eup %2892 }
 0x397   :  { %v633_v14 = vmul.f32 %v2893_v13, %v3256_v60  ;;  %vm638_vm0 = vweird.f32 %v2893_v13 }
 0x398   :  { %vm639_vm3 = vmor %vm637_vm2, %vm638_vm0 }
 0x399   :  { %v634_v19 = vsub.f32 1.0, %v633_v14 }
 0x39b   :  { %v635_v21 = vmul.f32 %v2893_v13, %v634_v19 }
 0x39d   :  { %v636_v63 = vadd.f32 %v2893_v13, %v635_v21 }
 0x39f   :  { %v640_v27 = vsel %vm639_vm3, %v2893_v13, %v636_v63 }
 0x3a0   :  { %v645_v34 = vsel %vm642_vm4, %v644_v8, %v640_v27  ;;  %v2747_v27 = vld [vmem:[%s3634_s5 + $0x270] sm:$0xff] }
 0x3a1   :  { %2837 = vpush %v645_v34 }
 0x3d2   :  { %s2838_s29 = spop %2837 }
 0x3d3   :  { %v3407_v3 = vstv %s2838_s29 }
 0x3d4   :  { %v648_v4 = vmul.f32 %v3407_v3, %v604_v30  ;;  %v649_v10 = vmul.f32 %v3407_v3, %v605_v28  ;;  %v650_v2 = vmul.f32 %v3407_v3, %v606_v31 }
 0x3d6   :  { %v2841_v11 = vcvt.f32.s32 %v648_v4  ;;  %v2849_v12 = vcvt.f32.s32 %v649_v10  ;;  %v2839_v14 = vand.u32 2147483647, %v648_v4  ;;  %v2844_v17 = vand.u32 2147483648, %v648_v4 }
 0x3d7   :  { %v2852_v20 = vand.u32 2147483648, %v649_v10  ;;  %v2847_v21 = vand.u32 2147483647, %v649_v10  ;;  %v2857_v23 = vcvt.f32.s32 %v650_v2  ;;  %v2860_v44 = vand.u32 2147483648, %v650_v2 }
 0x3d8   :  { %v2842_v13 = vcvt.s32.f32 %v2841_v11  ;;  %v2850_v15 = vcvt.s32.f32 %v2849_v12  ;;  %vm2840_vm5 = vcmp.lt.f32.partialorder %v2839_v14, 8388608.0  ;;  %v2855_v47 = vand.u32 2147483647, %v650_v2  ;;  %v2759_v12 = vld [vmem:[%s3634_s5 + $0x2d0] sm:$0xff]  ;;  %v2742_v14 = vld [vmem:[%s3634_s5 + $0x248] sm:$0xff] }
 0x3d9   :  { %vm2848_vm6 = vcmp.lt.f32.partialorder %v2847_v21, 8388608.0  ;;  %v2858_v34 = vcvt.s32.f32 %v2857_v23 }
 0x3da   :  { %v2843_v16 = vand.u32 2147483647, %v2842_v13  ;;  %v2851_v18 = vand.u32 2147483647, %v2850_v15  ;;  %vm2856_vm7 = vcmp.lt.f32.partialorder %v2855_v47, 8388608.0  ;;  %v3495_v13 = vmul.f32 %v3407_v3, %v607_v32  ;;  %v2734_v15 = vld [vmem:[%s3634_s5 + $0x208] sm:$0xff] }
 0x3db   :  { %v2859_v41 = vand.u32 2147483647, %v2858_v34  ;;  %v2758_v32 = vld [vmem:[%s3634_s5 + $0x2c8] sm:$0xff]  ;;  %v2775_v47 = vld [vmem:[%s3634_s5 + $0x350] sm:$0xff] }
 0x3dc   :  { %v2845_v19 = vor.u32 %v2844_v17, %v2843_v16  ;;  %v2853_v6 = vor.u32 %v2852_v20, %v2851_v18  ;;  %v2750_v16 = vld [vmem:[%s3634_s5 + $0x288] sm:$0xff]  ;;  %v2865_v3 = vcvt.f32.s32 %v3495_v13  ;;  %v2741_v17 = vld [vmem:[%s3634_s5 + $0x240] sm:$0xff]  ;;  %v2780_v18 = vld [vmem:[%s3634_s5 + $0x378] sm:$0xff] }
 0x3dd   :  { %v2861_v49 = vor.u32 %v2860_v44, %v2859_v41  ;;  %v2749_v20 = vld [vmem:[%s3634_s5 + $0x280] sm:$0xff]  ;;  %v2786_v34 = vld [vmem:[%s3634_s5 + $0x3a8] sm:$0xff]  ;;  %v2768_v44 = vld [vmem:[%s3634_s5 + $0x318] sm:$0xff] }
 0x3de   :  { %v2846_v22 = vsel %vm2840_vm5, %v2845_v19, %v648_v4  ;;  %v2854_v30 = vsel %vm2848_vm6, %v2853_v6, %v649_v10  ;;  %v2735_v4 = vld [vmem:[%s3634_s5 + $0x210] sm:$0xff]  ;;  %v2733_v19 = vld [vmem:[%s3634_s5 + $0x200] sm:$0xff]  ;;  %v2772_v6 = vld [vmem:[%s3634_s5 + $0x338] sm:$0xff] }
 0x3df   :  { %v656_v1 = vmax.f32 %v2846_v22, 0.0  ;;  %v657_v5 = vmax.f32 %v2854_v30, 0.0  ;;  %v2862_v54 = vsel %vm2856_vm7, %v2861_v49, %v650_v2  ;;  %v2751_v10 = vld [vmem:[%s3634_s5 + $0x290] sm:$0xff]  ;;  %v2757_v22 = vld [vmem:[%s3634_s5 + $0x2c0] sm:$0xff]  ;;  %v2788_v2 = vld [vmem:[%s3634_s5 + $0x3b8] sm:$0xff] }
 0x3e0   :  { %v658_v36 = vmax.f32 %v2862_v54, 0.0  ;;  %v2779_v30 = vld [vmem:[%s3634_s5 + $0x370] sm:$0xff]  ;;  %v2793_v41 = vld [vmem:[%s3634_s5 + $0x3e0] sm:$0xff]  ;;  %v2766_v54 = vld [vmem:[%s3634_s5 + $0x308] sm:$0xff] }
 0x3e1   :  { %v660_v28 = vmin.f32 %v656_v1, 255.0  ;;  %v661_v35 = vmin.f32 %v657_v5, 255.0  ;;  %v2866_v1 = vcvt.s32.f32 %v2865_v3  ;;  %v2787_v5 = vld [vmem:[%s3634_s5 + $0x3b0] sm:$0xff] }
 0x3e2   :  { %v662_v11 = vmin.f32 %v658_v36, 255.0  ;;  %v2767_v49 = vld [vmem:[%s3634_s5 + $0x310] sm:$0xff]  ;;  %v2781_v36 = vld [vmem:[%s3634_s5 + $0x380] sm:$0xff] }
 0x3e3   :  { %v665_v33 = vmul.f32 %v660_v28, %v3256_v60  ;;  %v666_v42 = vmul.f32 %v661_v35, %v3256_v60  ;;  %v2796_v28 = vld [vmem:[%s3634_s5 + $0x3f8] sm:$0xff]  ;;  %v2867_v23 = vand.u32 2147483647, %v2866_v1  ;;  %v2794_v35 = vld [vmem:[%s3634_s5 + $0x3e8] sm:$0xff] }
 0x3e4   :  { %v667_v29 = vmul.f32 %v662_v11, %v3256_v60 }
 0x3e5   :  { %v669_v63 = vpack.c.bf16 %v665_v33, %v665_v33  ;;  %v987_v50 = vpack.c.bf16 %v666_v42, %v666_v42  ;;  %v2776_v42 = vld [vmem:[%s3634_s5 + $0x358] sm:$0xff] }
 0x3e6   :  { %v1307_v21 = vpack.c.bf16 %v667_v29, %v667_v29 }
 0x3e7   :  { %822 = vmatmul.bf16.vlgmr.msrb.gmra.mxu2 %v669_v63  ;;  %v703_v9 = vrot.slane %v669_v63, 1  ;;  %v843_v8 = vrot.slane %v669_v63, 2  ;;  %v923_v31 = vrot.slane %v669_v63, 3  ;;  %v1083_v56 = vrot.slane %v987_v50, 1 }
 0x3e8   :  { %1453 = vmatpush.bf16.msrb.mxu2 %v2748_v7  ;;  %v1163_v59 = vrot.slane %v987_v50, 2  ;;  %v1243_v61 = vrot.slane %v987_v50, 3  ;;  %v1403_v33 = vrot.slane %v1307_v21, 1  ;;  %v2771_v7 = vld [vmem:[%s3634_s5 + $0x330] sm:$0xff]  ;;  %v1483_v63 = vrot.slane %v1307_v21, 2 }
 0x3e9   :  { %761 = vmatmul.bf16.vlgmr.msrb.gmra.mxu0 %v703_v9  ;;  %901 = vmatmul.bf16.vlgmr.msrb.gmra.mxu3 %v843_v8  ;;  %v1563_v9 = vrot.slane %v1307_v21, 3  ;;  %v2868_v8 = vand.u32 2147483648, %v3495_v13 }
 0x3ea   :  { %981 = vmatmul.bf16.vlgmr.msra.gmra.mxu1 %v923_v31  ;;  %1372 = vmatpush.bf16.msrb.mxu0 %v2740_v24  ;;  %v2795_v24 = vld [vmem:[%s3634_s5 + $0x3f0] sm:$0xff]  ;;  %v2778_v31 = vld [vmem:[%s3634_s5 + $0x368] sm:$0xff] }
 0x3eb   :  { %1533 = vmatpush.bf16.msrb.mxu3 %v2756_v25  ;;  %1613 = vmatpush.bf16.msra.mxu1 %v2764_v26  ;;  %v2863_v25 = vand.u32 2147483647, %v3495_v13  ;;  %v2770_v26 = vld [vmem:[%s3634_s5 + $0x328] sm:$0xff] }
 0x3ec   :  { %1454 = vmatpush.bf16.msrb.mxu2 %v2747_v27  ;;  %v2869_v27 = vor.u32 %v2868_v8, %v2867_v23 }
 0x3ed   :  { %vm2864_vm8 = vcmp.lt.f32.partialorder %v2863_v25, 8388608.0 }
 0x3ee   :  { %1373 = vmatpush.bf16.msrb.mxu0 %v2739_v37  ;;  %v2777_v37 = vld [vmem:[%s3634_s5 + $0x360] sm:$0xff] }
 0x3ef   :  { %1534 = vmatpush.bf16.msrb.mxu3 %v2755_v38  ;;  %1614 = vmatpush.bf16.msra.mxu1 %v2763_v39  ;;  %v2769_v38 = vld [vmem:[%s3634_s5 + $0x320] sm:$0xff]  ;;  %v2870_v39 = vsel %vm2864_vm8, %v2869_v27, %v3495_v13 }
 0x3f0   :  { %1455 = vmatpush.bf16.msrb.mxu2 %v2746_v40  ;;  %v2785_v40 = vld [vmem:[%s3634_s5 + $0x3a0] sm:$0xff] }
 0x3f2   :  { %1374 = vmatpush.bf16.msrb.mxu0 %v2738_v43  ;;  %v659_v43 = vmax.f32 %v2870_v39, 0.0 }
 0x3f3   :  { %1535 = vmatpush.bf16.msrb.mxu3 %v2754_v45  ;;  %1615 = vmatpush.bf16.msra.mxu1 %v2762_v46  ;;  %v2784_v45 = vld [vmem:[%s3634_s5 + $0x398] sm:$0xff] }
 0x3f4   :  { %1456 = vmatpush.bf16.msrb.mxu2 %v2745_v48  ;;  %v2792_v46 = vld [vmem:[%s3634_s5 + $0x3d8] sm:$0xff]  ;;  %v663_v48 = vmin.f32 %v659_v43, 255.0 }
 0x3f6   :  { %1375 = vmatpush.bf16.msrb.mxu0 %v2737_v51  ;;  %v2791_v51 = vld [vmem:[%s3634_s5 + $0x3d0] sm:$0xff] }
 0x3f7   :  { %1536 = vmatpush.bf16.msrb.mxu3 %v2753_v52  ;;  %1616 = vmatpush.bf16.msra.mxu1 %v2761_v53  ;;  %v2774_v52 = vld [vmem:[%s3634_s5 + $0x348] sm:$0xff]  ;;  %v668_v53 = vmul.f32 %v663_v48, %v3256_v60  ;;  %v2773_v60 = vld [vmem:[%s3634_s5 + $0x340] sm:$0xff] }
 0x3f8   :  { %1141 = vmatmul.bf16.vlgmr.msra.gmra.mxu2 %v1083_v56  ;;  %v2790_v56 = vld [vmem:[%s3634_s5 + $0x3c8] sm:$0xff] }
 0x3f9   :  { %1457 = vmatpush.bf16.msrb.mxu2 %v2744_v55  ;;  %1060 = vmatmul.bf16.vlgmr.msra.gmra.mxu0 %v987_v50  ;;  %v2783_v50 = vld [vmem:[%s3634_s5 + $0x390] sm:$0xff]  ;;  %v2782_v55 = vld [vmem:[%s3634_s5 + $0x388] sm:$0xff] }
 0x3fa   :  { %1221 = vmatmul.bf16.vlgmr.msra.gmra.mxu3 %v1163_v59  ;;  %1301 = vmatmul.bf16.vlgmr.msrb.gmra.mxu1 %v1243_v61  ;;  %v2789_v59 = vld [vmem:[%s3634_s5 + $0x3c0] sm:$0xff] }
 0x3fb   :  { %1376 = vmatpush.bf16.msrb.mxu0 %v2736_v57  ;;  %1537 = vmatpush.bf16.msrb.mxu3 %v2752_v58  ;;  %v1627_v57 = vpack.c.bf16 %v668_v53, %v668_v53  ;;  %v2765_v58 = vld [vmem:[%s3634_s5 + $0x300] sm:$0xff] }
 0x3fc   :  { %1617 = vmatpush.bf16.msra.mxu1 %v2760_v62 }
 0x3fd   :  { %1458 = vmatpush.bf16.msrb.mxu2 %v2743_v0  ;;  %v1723_v61 = vrot.slane %v1627_v57, 1  ;;  %v1803_v62 = vrot.slane %v1627_v57, 2  ;;  %v1883_v0 = vrot.slane %v1627_v57, 3 }
 0x3ff   :  { %1377 = vmatpush.bf16.msrb.mxu0 %v2735_v4  ;;  %1538 = vmatpush.bf16.msrb.mxu3 %v2751_v10 }
 0x400   :  { %1618 = vmatpush.bf16.msra.mxu1 %v2759_v12 }
 0x401   :  { %1459 = vmatpush.bf16.msrb.mxu2 %v2742_v14 }
 0x403   :  { %1378 = vmatpush.bf16.msrb.mxu0 %v2734_v15  ;;  %1539 = vmatpush.bf16.msrb.mxu3 %v2750_v16 }
 0x404   :  { %1619 = vmatpush.bf16.msra.mxu1 %v2758_v32 }
 0x405   :  { %1460 = vmatpush.bf16.msrb.mxu2 %v2741_v17 }
 0x407   :  { %1379 = vmatpush.bf16.msrb.mxu0 %v2733_v19  ;;  %1540 = vmatpush.bf16.msrb.mxu3 %v2749_v20 }
 0x408   :  { %1620 = vmatpush.bf16.msra.mxu1 %v2757_v22  ;;  %1461 = vmatmul.bf16.vlgmr.msrb.gmra.mxu2 %v1403_v33 }
 0x409   :  { %1773 = vmatpush.bf16.msra.mxu2 %v2780_v18 }
 0x40a   :  { %1380 = vmatmul.bf16.vlgmr.msrb.gmra.mxu0 %v1307_v21  ;;  %1541 = vmatmul.bf16.vlgmr.msrb.gmra.mxu3 %v1483_v63 }
 0x40b   :  { %1692 = vmatpush.bf16.msra.mxu0 %v2772_v6  ;;  %1853 = vmatpush.bf16.msra.mxu3 %v2788_v2 }
 0x40c   :  { %1933 = vmatpush.bf16.msrb.mxu1 %v2796_v28 }
 0x40d   :  { %1774 = vmatpush.bf16.msra.mxu2 %v2779_v30  ;;  %1621 = vmatmul.bf16.vlgmr.msra.gmra.mxu1 %v1563_v9 }
 0x40f   :  { %1693 = vmatpush.bf16.msra.mxu0 %v2771_v7  ;;  %1854 = vmatpush.bf16.msra.mxu3 %v2787_v5 }
 0x410   :  { %1934 = vmatpush.bf16.msrb.mxu1 %v2795_v24 }
 0x411   :  { %1775 = vmatpush.bf16.msra.mxu2 %v2778_v31 }
 0x413   :  { %1694 = vmatpush.bf16.msra.mxu0 %v2770_v26  ;;  %1855 = vmatpush.bf16.msra.mxu3 %v2786_v34 }
 0x414   :  { %1935 = vmatpush.bf16.msrb.mxu1 %v2794_v35 }
 0x415   :  { %1776 = vmatpush.bf16.msra.mxu2 %v2777_v37 }
 0x417   :  { %1695 = vmatpush.bf16.msra.mxu0 %v2769_v38  ;;  %1856 = vmatpush.bf16.msra.mxu3 %v2785_v40 }
 0x418   :  { %1936 = vmatpush.bf16.msrb.mxu1 %v2793_v41 }
 0x419   :  { %1777 = vmatpush.bf16.msra.mxu2 %v2776_v42 }
 0x41b   :  { %1696 = vmatpush.bf16.msra.mxu0 %v2768_v44  ;;  %1857 = vmatpush.bf16.msra.mxu3 %v2784_v45  ;;  %v2887_v44 = vld [vmem:[%s3635_s6] ss:$0 sm:$0xff] }
 0x41c   :  { %1937 = vmatpush.bf16.msrb.mxu1 %v2792_v46 }
 0x41d   :  { %1778 = vmatpush.bf16.msra.mxu2 %v2775_v47 }
 0x41f   :  { %1697 = vmatpush.bf16.msra.mxu0 %v2767_v49  ;;  %1858 = vmatpush.bf16.msra.mxu3 %v2783_v50 }
 0x420   :  { %1938 = vmatpush.bf16.msrb.mxu1 %v2791_v51 }
 0x421   :  { %1779 = vmatpush.bf16.msra.mxu2 %v2774_v52 }
 0x423   :  { %1698 = vmatpush.bf16.msra.mxu0 %v2766_v54  ;;  %1859 = vmatpush.bf16.msra.mxu3 %v2782_v55 }
 0x424   :  { %1939 = vmatpush.bf16.msrb.mxu1 %v2790_v56 }
 0x425   :  { %1780 = vmatpush.bf16.msra.mxu2 %v2773_v60 }
 0x427   :  { %1699 = vmatpush.bf16.msra.mxu0 %v2765_v58  ;;  %1860 = vmatpush.bf16.msra.mxu3 %v2781_v36 }
 0x428   :  { %1940 = vmatpush.bf16.msrb.mxu1 %v2789_v59  ;;  %1781 = vmatmul.bf16.vlgmr.msra.gmra.mxu2 %v1723_v61 }
 0x42a   :  { %1700 = vmatmul.bf16.vlgmr.msra.gmra.mxu0 %v1627_v57  ;;  %1861 = vmatmul.bf16.vlgmr.msra.gmra.mxu3 %v1803_v62 }
 0x42b   :  { %1941 = vmatmul.bf16.vlgmr.msrb.gmra.mxu1 %v1883_v0 }
 0x466   :  { %v762_v4 = vpop.f32.mrf.mxu0 }
 0x467   :  { %v982_v10 = vpop.f32.mrf.mxu1 }
 0x46a   :  { %v823_v11 = vpop.f32.mrf.mxu2 }
 0x46b   :  { %v824_v22 = vadd.f32 %v823_v11, %v762_v4 }
 0x46c   :  { %v902_v12 = vpop.f32.mrf.mxu3 }
 0x46d   :  { %v906_v2 = vadd.f32 %v902_v12, %v824_v22 }
 0x46e   :  { %v764_v13 = vpop.f32.mrf.mxu0 }
 0x46f   :  { %v984_v14 = vpop.f32.mrf.mxu1  ;;  %v986_v30 = vadd.f32 %v982_v10, %v906_v2 }
 0x472   :  { %v825_v15 = vpop.f32.mrf.mxu2 }
 0x474   :  { %v904_v16 = vpop.f32.mrf.mxu3 }
 0x476   :  { %v1061_v29 = vpop.f32.mrf.mxu0 }
 0x477   :  { %v1302_v32 = vpop.f32.mrf.mxu1  ;;  %v1065_v23 = vadd.f32 %v1061_v29, %v986_v30 }
 0x47b   :  { %v1142_v3 = vpop.f32.mrf.mxu2 }
 0x47c   :  { %v1146_v5 = vadd.f32 %v1142_v3, %v1065_v23 }
 0x47d   :  { %v1222_v17 = vpop.f32.mrf.mxu3 }
 0x47e   :  { %v1063_v18 = vpop.f32.mrf.mxu0  ;;  %v1226_v9 = vadd.f32 %v1222_v17, %v1146_v5 }
 0x47f   :  { %v1304_v19 = vpop.f32.mrf.mxu1 }
 0x480   :  { %v1306_v31 = vadd.f32 %v1302_v32, %v1226_v9 }
 0x483   :  { %v1144_v20 = vpop.f32.mrf.mxu2 }
 0x485   :  { %v1224_v21 = vpop.f32.mrf.mxu3 }
 0x487   :  { %v1381_v6 = vpop.f32.mrf.mxu0 }
 0x488   :  { %v1385_v25 = vadd.f32 %v1381_v6, %v1306_v31 }
 0x48a   :  { %v1622_v1 = vpop.f32.mrf.mxu1 }
 0x48b   :  { %v1462_v28 = vpop.f32.mrf.mxu2 }
 0x48c   :  { %v1466_v26 = vadd.f32 %v1462_v28, %v1385_v25 }
 0x48d   :  { %v1542_v33 = vpop.f32.mrf.mxu3 }
 0x48e   :  { %v1546_v27 = vadd.f32 %v1542_v33, %v1466_v26 }
 0x48f   :  { %v1383_v7 = vpop.f32.mrf.mxu0 }
 0x490   :  { %v1626_v37 = vadd.f32 %v1622_v1, %v1546_v27 }
 0x492   :  { %v1624_v63 = vpop.f32.mrf.mxu1 }
 0x493   :  { %v1464_v24 = vpop.f32.mrf.mxu2 }
 0x495   :  { %v1544_v8 = vpop.f32.mrf.mxu3 }
 0x4a7   :  { %v1701_v34 = vpop.f32.mrf.mxu0 }
 0x4a8   :  { %v1942_v35 = vpop.f32.mrf.mxu1  ;;  %v1705_v38 = vadd.f32 %v1701_v34, %v1626_v37 }
 0x4ab   :  { %v1782_v39 = vpop.f32.mrf.mxu2 }
 0x4ac   :  { %v1786_v40 = vadd.f32 %v1782_v39, %v1705_v38 }
 0x4ad   :  { %v1862_v41 = vpop.f32.mrf.mxu3 }
 0x4ae   :  { %v1866_v42 = vadd.f32 %v1862_v41, %v1786_v40 }
 0x4af   :  { %v1703_v43 = vpop.f32.mrf.mxu0 }
 0x4b0   :  { %v1944_v45 = vpop.f32.mrf.mxu1  ;;  %v1946_v46 = vadd.f32 %v1942_v35, %v1866_v42 }
 0x4b2   :  { %v1951_v47 = vadd.f32 %v2887_v44, %v1946_v46 }
 0x4b3   :  { %v1784_v48 = vpop.f32.mrf.mxu2 }
 0x4b4   :  { %1952 = vst [vmem:[#allocation2] sm:$0x3] %v1951_v47 }
 0x4b5   :  { %v1864_v49 = vpop.f32.mrf.mxu3  ;;  %1963 = dma.vmem_to_hbm [thread:$0]  %s1959_s20, 32, %s1961_s22, [#allocation3]  }
 0x4b6   :  { %2918 = dma.done.wait [#allocation3], 32  }
 0x4b7   :  { %2919 = vsyncadd [#allocation3], 4294967264 }
 0x4b8   :  { %1968 = vsyncpa [#allocation3], 1 }

</bundles_post_ra>
